<compile_context>
chip_gen: v5e
topology: v5e:2x2
jax: 0.10.0
libtpu: 0.0.40
codegen_flags: <defaults>
</compile_context>

<pallas_src>
import functools

import jax
import jax.numpy as jnp
import numpy as np
from jax.experimental import pallas as pl
from jax.experimental.pallas import tpu as pltpu


def _spatial_attention_kernel(w_ref, x_ref, y_ref, *attn_out,
                              H, W, kh, kw, n_in, emit_attn):
    # w_ref:    SMEM (n_in*kh*kw,) f32  conv weights, index (c*kh + ky)*kw + kx
    # x_ref:    VMEM (bt, C, H*W)       input dtype
    # y_ref:    VMEM (bt, C, H*W)       input dtype
    # attn_out: optionally (attn_ref,)  VMEM (bt, 1, H*W) f32
    HW = H * W
    pad_h, pad_w = kh // 2, kw // 2

    # Channel statistics for the whole batch tile (sublane reduce, f32 acc).
    xv = x_ref[...]                                        # (bt, C, HW)
    avg = jnp.mean(xv, axis=1, dtype=jnp.float32)          # (bt, HW)
    mx = jnp.max(xv, axis=1).astype(jnp.float32)           # (bt, HW)
    maps = (avg, mx)                                       # torch.cat([avg, max]) order

    # Flattened-spatial index helpers.  Column index is built with threshold
    # sums (compares + adds) instead of vector integer div/mod.
    pos = jax.lax.broadcasted_iota(jnp.int32, (1, HW), 1)
    row = jnp.zeros_like(pos)
    for r in range(1, H):
        row = row + (pos >= r * W).astype(jnp.int32)
    col = pos - row * W

    # Vertically shifted, zero-padded maps: vshift[c][ky][p] = map_c[p + sy*W].
    vshift = []
    for c in range(n_in):
        per_c = []
        for ky in range(kh):
            sy = ky - pad_h
            if sy == 0:
                per_c.append(maps[c])
            else:
                rolled = pltpu.roll(maps[c], shift=(-sy * W) % HW, axis=1)
                ok = jnp.logical_and(pos + sy * W >= 0, pos + sy * W < HW)
                per_c.append(jnp.where(ok, rolled, 0.0))
        vshift.append(per_c)

    # conv = sum_kx  hshift_sx( sum_{c,ky} w[c,ky,kx] * vshift[c][ky] )
    acc = None
    for kx in range(kw):
        sx = kx - pad_w
        s = None
        for c in range(n_in):
            for ky in range(kh):
                t = w_ref[(c * kh + ky) * kw + kx] * vshift[c][ky]
                s = t if s is None else s + t
        if sx != 0:
            rolled = pltpu.roll(s, shift=(-sx) % HW, axis=1)
            ok = jnp.logical_and(col + sx >= 0, col + sx < W)
            s = jnp.where(ok, rolled, 0.0)
        acc = s if acc is None else acc + s

    attn = jax.nn.sigmoid(acc)                             # (bt, HW) f32
    # Rescale in the input dtype and store the whole lane-dense block at once.
    scale = attn.astype(y_ref.dtype)[:, None, :]           # (bt, 1, HW)
    y_ref[...] = (x_ref[...] * scale).astype(y_ref.dtype)
    if emit_attn:
        attn_out[0][...] = attn[:, None, :].astype(attn_out[0].dtype)


def _pick_batch_tile(N, per_sample_bytes, budget_bytes=8 << 20, max_bt=64):
    """Largest divisor of N under the per-block VMEM budget, capped at N//2 so
    the 1-D parallel grid has >=2 steps (keeps both v7x TensorCores busy)."""
    cap = max(1, N // 2)
    bt = max(1, min(cap, max_bt, budget_bytes // max(per_sample_bytes, 1)))
    while N % bt:
        bt -= 1
    return bt


def spatial_attention(x, conv_weight, return_attention=False):
    """CBAM SpatialAttention forward.

    x: (N, C, H, W). conv_weight: (1, 2, K, K) (nn.Conv2d(2, 1, K, bias=False)).
    Returns x * sigmoid(conv([mean_c(x), max_c(x)])) (and the attention map if
    requested).
    """
    N, C, H, W = x.shape
    HW = H * W
    out_c, n_in, kh, kw = conv_weight.shape
    assert out_c == 1 and n_in == 2

    w_flat = jnp.asarray(conv_weight, jnp.float32).reshape(n_in * kh * kw)
    x2 = jnp.reshape(x, (N, C, HW))                        # lane-dense layout

    # Padded per-sample block footprint (sublane pad on C, lane pad on HW).
    pad_c = -(-C // 8) * 8
    pad_hw = -(-HW // 128) * 128
    per_sample = pad_c * pad_hw * x.dtype.itemsize
    bt = _pick_batch_tile(N, per_sample)

    kernel = functools.partial(_spatial_attention_kernel,
                               H=H, W=W, kh=kh, kw=kw, n_in=n_in,
                               emit_attn=return_attention)

    out_shape = [jax.ShapeDtypeStruct((N, C, HW), x.dtype)]
    out_specs = [pl.BlockSpec((bt, C, HW), lambda n: (n, 0, 0))]
    if return_attention:
        out_shape.append(jax.ShapeDtypeStruct((N, 1, HW), jnp.float32))
        out_specs.append(pl.BlockSpec((bt, 1, HW), lambda n: (n, 0, 0)))

    # VMEM budget: double-buffered x and y blocks (+ attn) + f32 temporaries,
    # capped at 48 MiB so it also fits v7x's 64 MiB physical VMEM.
    x_block = bt * per_sample
    attn_block = (bt * 8 * pad_hw * 4) if return_attention else 0
    scratch = 24 * bt * pad_hw * 4
    est = 4 * x_block + 2 * attn_block + scratch + (2 << 20)
    vmem_limit = int(min(max(est, 32 << 20), 48 << 20))
    # TODO(synk): for very large single-sample C*H*W, add a channel-split grid
    # axis (attention pass + rescale pass) instead of one whole-sample block.

    out = pl.pallas_call(
        kernel,
        out_shape=tuple(out_shape),
        grid_spec=pltpu.PrefetchScalarGridSpec(
            num_scalar_prefetch=0,
            grid=(N // bt,),
            in_specs=[
                pl.BlockSpec(memory_space=pltpu.MemorySpace.SMEM),  # weights
                pl.BlockSpec((bt, C, HW), lambda n: (n, 0, 0)),     # x
            ],
            out_specs=tuple(out_specs),
        ),
        compiler_params=pltpu.CompilerParams(
            dimension_semantics=("parallel",),
            vmem_limit_bytes=vmem_limit),
    )(w_flat, x2)

    y = jnp.reshape(out[0], (N, C, H, W))
    if return_attention:
        return y, jnp.reshape(out[1], (N, 1, H, W))
    return y


def _reference(x, conv_weight):
    pad = conv_weight.shape[-1] // 2
    avg = jnp.mean(x, axis=1, keepdims=True)
    mx = jnp.max(x, axis=1, keepdims=True)
    xc = jnp.concatenate([avg, mx], axis=1)
    conv = jax.lax.conv_general_dilated(
        xc, conv_weight, window_strides=(1, 1),
        padding=((pad, pad), (pad, pad)),
        dimension_numbers=("NCHW", "OIHW", "NCHW"),
        precision=jax.lax.Precision.HIGHEST)
    attn = jax.nn.sigmoid(conv)
    return x * attn, attn


if __name__ == "__main__":
    key = jax.random.PRNGKey(0)
    kx_, kw_ = jax.random.split(key)

    N, C, H, W = 2, 4, 16, 16
    K = 7
    x = jax.random.normal(kx_, (N, C, H, W), dtype=jnp.float32)
    # nn.Conv2d(2, 1, 7, bias=False) weight shape, deterministic.
    conv_weight = 0.1 * jax.random.normal(kw_, (1, 2, K, K), dtype=jnp.float32)

    y, attn = spatial_attention(x, conv_weight, return_attention=True)
    y = jax.block_until_ready(y)
    attn = jax.block_until_ready(attn)

    y_only = jax.block_until_ready(
        spatial_attention(x, conv_weight, return_attention=False))

    y_ref, attn_ref = _reference(x, conv_weight)
    np.testing.assert_allclose(np.asarray(y), np.asarray(y_ref),
                               rtol=1e-4, atol=1e-4)
    np.testing.assert_allclose(np.asarray(attn), np.asarray(attn_ref),
                               rtol=1e-4, atol=1e-4)
    np.testing.assert_allclose(np.asarray(y_only), np.asarray(y),
                               rtol=1e-6, atol=1e-6)

    print("KERNEL_OK")
</pallas_src>

<mosaic_0001>
module attributes {stable_mosaic.version = 11 : i64} {
  func.func @_spatial_attention_kernel(%arg0: i32, %arg1: memref<98xf32, #tpu.memory_space<smem>>, %arg2: memref<1x4x256xf32, #tpu.memory_space<vmem>>, %arg3: memref<1x4x256xf32, #tpu.memory_space<vmem>>, %arg4: memref<1x1x256xf32, #tpu.memory_space<vmem>>) attributes {dimension_semantics = [#tpu.dimension_semantics<parallel>], iteration_bounds = array<i64: 2>, scalar_prefetch = 0 : i64, scratch_operands = 0 : i64, tpu.core_type = #tpu.core_type<tc>, window_params = [{transform_indices = @transform_0, window_bounds = array<i64: 98>}, {transform_indices = @transform_1, window_bounds = array<i64: 1, 4, 256>}, {transform_indices = @transform_2, window_bounds = array<i64: 1, 4, 256>}, {transform_indices = @transform_3, window_bounds = array<i64: 1, 1, 256>}]} {
    %c0 = arith.constant 0 : index
    %c0_0 = arith.constant 0 : index
    %c0_1 = arith.constant 0 : index
    %0 = vector.load %arg2[%c0, %c0_0, %c0_1] : memref<1x4x256xf32, #tpu.memory_space<vmem>>, vector<1x4x256xf32>
    %cst = arith.constant dense<0.000000e+00> : vector<1x256xf32>
    %1 = vector.multi_reduction <add>, %0, %cst [1] : vector<1x4x256xf32> to vector<1x256xf32>
    %cst_2 = arith.constant 4.000000e+00 : f32
    %2 = vector.broadcast %cst_2 : f32 to vector<1x256xf32>
    %3 = arith.divf %1, %2 : vector<1x256xf32>
    %cst_3 = arith.constant dense<0xFF800000> : vector<1x256xf32>
    %4 = vector.multi_reduction <maximumf>, %0, %cst_3 [1] : vector<1x4x256xf32> to vector<1x256xf32>
    %5 = tpu.iota {dimensions = array<i32: 1>} : vector<1x256xi32>
    %c0_i32 = arith.constant 0 : i32
    %6 = vector.broadcast %c0_i32 : i32 to vector<1x256xi32>
    %c16_i32 = arith.constant 16 : i32
    %7 = vector.broadcast %c16_i32 : i32 to vector<1x256xi32>
    %8 = arith.cmpi sge, %5, %7 : vector<1x256xi32>
    %9 = arith.extui %8 : vector<1x256xi1> to vector<1x256xi32>
    %10 = arith.addi %6, %9 : vector<1x256xi32>
    %c32_i32 = arith.constant 32 : i32
    %11 = vector.broadcast %c32_i32 : i32 to vector<1x256xi32>
    %12 = arith.cmpi sge, %5, %11 : vector<1x256xi32>
    %13 = arith.extui %12 : vector<1x256xi1> to vector<1x256xi32>
    %14 = arith.addi %10, %13 : vector<1x256xi32>
    %c48_i32 = arith.constant 48 : i32
    %15 = vector.broadcast %c48_i32 : i32 to vector<1x256xi32>
    %16 = arith.cmpi sge, %5, %15 : vector<1x256xi32>
    %17 = arith.extui %16 : vector<1x256xi1> to vector<1x256xi32>
    %18 = arith.addi %14, %17 : vector<1x256xi32>
    %c64_i32 = arith.constant 64 : i32
    %19 = vector.broadcast %c64_i32 : i32 to vector<1x256xi32>
    %20 = arith.cmpi sge, %5, %19 : vector<1x256xi32>
    %21 = arith.extui %20 : vector<1x256xi1> to vector<1x256xi32>
    %22 = arith.addi %18, %21 : vector<1x256xi32>
    %c80_i32 = arith.constant 80 : i32
    %23 = vector.broadcast %c80_i32 : i32 to vector<1x256xi32>
    %24 = arith.cmpi sge, %5, %23 : vector<1x256xi32>
    %25 = arith.extui %24 : vector<1x256xi1> to vector<1x256xi32>
    %26 = arith.addi %22, %25 : vector<1x256xi32>
    %c96_i32 = arith.constant 96 : i32
    %27 = vector.broadcast %c96_i32 : i32 to vector<1x256xi32>
    %28 = arith.cmpi sge, %5, %27 : vector<1x256xi32>
    %29 = arith.extui %28 : vector<1x256xi1> to vector<1x256xi32>
    %30 = arith.addi %26, %29 : vector<1x256xi32>
    %c112_i32 = arith.constant 112 : i32
    %31 = vector.broadcast %c112_i32 : i32 to vector<1x256xi32>
    %32 = arith.cmpi sge, %5, %31 : vector<1x256xi32>
    %33 = arith.extui %32 : vector<1x256xi1> to vector<1x256xi32>
    %34 = arith.addi %30, %33 : vector<1x256xi32>
    %c128_i32 = arith.constant 128 : i32
    %35 = vector.broadcast %c128_i32 : i32 to vector<1x256xi32>
    %36 = arith.cmpi sge, %5, %35 : vector<1x256xi32>
    %37 = arith.extui %36 : vector<1x256xi1> to vector<1x256xi32>
    %38 = arith.addi %34, %37 : vector<1x256xi32>
    %c144_i32 = arith.constant 144 : i32
    %39 = vector.broadcast %c144_i32 : i32 to vector<1x256xi32>
    %40 = arith.cmpi sge, %5, %39 : vector<1x256xi32>
    %41 = arith.extui %40 : vector<1x256xi1> to vector<1x256xi32>
    %42 = arith.addi %38, %41 : vector<1x256xi32>
    %c160_i32 = arith.constant 160 : i32
    %43 = vector.broadcast %c160_i32 : i32 to vector<1x256xi32>
    %44 = arith.cmpi sge, %5, %43 : vector<1x256xi32>
    %45 = arith.extui %44 : vector<1x256xi1> to vector<1x256xi32>
    %46 = arith.addi %42, %45 : vector<1x256xi32>
    %c176_i32 = arith.constant 176 : i32
    %47 = vector.broadcast %c176_i32 : i32 to vector<1x256xi32>
    %48 = arith.cmpi sge, %5, %47 : vector<1x256xi32>
    %49 = arith.extui %48 : vector<1x256xi1> to vector<1x256xi32>
    %50 = arith.addi %46, %49 : vector<1x256xi32>
    %c192_i32 = arith.constant 192 : i32
    %51 = vector.broadcast %c192_i32 : i32 to vector<1x256xi32>
    %52 = arith.cmpi sge, %5, %51 : vector<1x256xi32>
    %53 = arith.extui %52 : vector<1x256xi1> to vector<1x256xi32>
    %54 = arith.addi %50, %53 : vector<1x256xi32>
    %c208_i32 = arith.constant 208 : i32
    %55 = vector.broadcast %c208_i32 : i32 to vector<1x256xi32>
    %56 = arith.cmpi sge, %5, %55 : vector<1x256xi32>
    %57 = arith.extui %56 : vector<1x256xi1> to vector<1x256xi32>
    %58 = arith.addi %54, %57 : vector<1x256xi32>
    %c224_i32 = arith.constant 224 : i32
    %59 = vector.broadcast %c224_i32 : i32 to vector<1x256xi32>
    %60 = arith.cmpi sge, %5, %59 : vector<1x256xi32>
    %61 = arith.extui %60 : vector<1x256xi1> to vector<1x256xi32>
    %62 = arith.addi %58, %61 : vector<1x256xi32>
    %c240_i32 = arith.constant 240 : i32
    %63 = vector.broadcast %c240_i32 : i32 to vector<1x256xi32>
    %64 = arith.cmpi sge, %5, %63 : vector<1x256xi32>
    %65 = arith.extui %64 : vector<1x256xi1> to vector<1x256xi32>
    %66 = arith.addi %62, %65 : vector<1x256xi32>
    %c16_i32_4 = arith.constant 16 : i32
    %67 = vector.broadcast %c16_i32_4 : i32 to vector<1x256xi32>
    %68 = arith.muli %66, %67 : vector<1x256xi32>
    %69 = arith.subi %5, %68 : vector<1x256xi32>
    %c48_i32_5 = arith.constant 48 : i32
    %70 = tpu.dynamic_rotate %3 by %c48_i32_5 dim 1 : vector<1x256xf32>, i32 -> vector<1x256xf32>
    %c-48_i32 = arith.constant -48 : i32
    %71 = vector.broadcast %c-48_i32 : i32 to vector<1x256xi32>
    %72 = arith.addi %5, %71 : vector<1x256xi32>
    %c0_i32_6 = arith.constant 0 : i32
    %73 = vector.broadcast %c0_i32_6 : i32 to vector<1x256xi32>
    %74 = arith.cmpi sge, %72, %73 : vector<1x256xi32>
    %c-48_i32_7 = arith.constant -48 : i32
    %75 = vector.broadcast %c-48_i32_7 : i32 to vector<1x256xi32>
    %76 = arith.addi %5, %75 : vector<1x256xi32>
    %c256_i32 = arith.constant 256 : i32
    %77 = vector.broadcast %c256_i32 : i32 to vector<1x256xi32>
    %78 = arith.cmpi slt, %76, %77 : vector<1x256xi32>
    %79 = arith.andi %74, %78 : vector<1x256xi1>
    %cst_8 = arith.constant 0.000000e+00 : f32
    %80 = vector.broadcast %cst_8 : f32 to vector<1x256xf32>
    %81 = arith.select %79, %70, %80 : vector<1x256xi1>, vector<1x256xf32>
    %c32_i32_9 = arith.constant 32 : i32
    %82 = tpu.dynamic_rotate %3 by %c32_i32_9 dim 1 : vector<1x256xf32>, i32 -> vector<1x256xf32>
    %c-32_i32 = arith.constant -32 : i32
    %83 = vector.broadcast %c-32_i32 : i32 to vector<1x256xi32>
    %84 = arith.addi %5, %83 : vector<1x256xi32>
    %c0_i32_10 = arith.constant 0 : i32
    %85 = vector.broadcast %c0_i32_10 : i32 to vector<1x256xi32>
    %86 = arith.cmpi sge, %84, %85 : vector<1x256xi32>
    %c-32_i32_11 = arith.constant -32 : i32
    %87 = vector.broadcast %c-32_i32_11 : i32 to vector<1x256xi32>
    %88 = arith.addi %5, %87 : vector<1x256xi32>
    %c256_i32_12 = arith.constant 256 : i32
    %89 = vector.broadcast %c256_i32_12 : i32 to vector<1x256xi32>
    %90 = arith.cmpi slt, %88, %89 : vector<1x256xi32>
    %91 = arith.andi %86, %90 : vector<1x256xi1>
    %cst_13 = arith.constant 0.000000e+00 : f32
    %92 = vector.broadcast %cst_13 : f32 to vector<1x256xf32>
    %93 = arith.select %91, %82, %92 : vector<1x256xi1>, vector<1x256xf32>
    %c16_i32_14 = arith.constant 16 : i32
    %94 = tpu.dynamic_rotate %3 by %c16_i32_14 dim 1 : vector<1x256xf32>, i32 -> vector<1x256xf32>
    %c-16_i32 = arith.constant -16 : i32
    %95 = vector.broadcast %c-16_i32 : i32 to vector<1x256xi32>
    %96 = arith.addi %5, %95 : vector<1x256xi32>
    %c0_i32_15 = arith.constant 0 : i32
    %97 = vector.broadcast %c0_i32_15 : i32 to vector<1x256xi32>
    %98 = arith.cmpi sge, %96, %97 : vector<1x256xi32>
    %c-16_i32_16 = arith.constant -16 : i32
    %99 = vector.broadcast %c-16_i32_16 : i32 to vector<1x256xi32>
    %100 = arith.addi %5, %99 : vector<1x256xi32>
    %c256_i32_17 = arith.constant 256 : i32
    %101 = vector.broadcast %c256_i32_17 : i32 to vector<1x256xi32>
    %102 = arith.cmpi slt, %100, %101 : vector<1x256xi32>
    %103 = arith.andi %98, %102 : vector<1x256xi1>
    %cst_18 = arith.constant 0.000000e+00 : f32
    %104 = vector.broadcast %cst_18 : f32 to vector<1x256xf32>
    %105 = arith.select %103, %94, %104 : vector<1x256xi1>, vector<1x256xf32>
    %c240_i32_19 = arith.constant 240 : i32
    %106 = tpu.dynamic_rotate %3 by %c240_i32_19 dim 1 : vector<1x256xf32>, i32 -> vector<1x256xf32>
    %c16_i32_20 = arith.constant 16 : i32
    %107 = vector.broadcast %c16_i32_20 : i32 to vector<1x256xi32>
    %108 = arith.addi %5, %107 : vector<1x256xi32>
    %c0_i32_21 = arith.constant 0 : i32
    %109 = vector.broadcast %c0_i32_21 : i32 to vector<1x256xi32>
    %110 = arith.cmpi sge, %108, %109 : vector<1x256xi32>
    %c16_i32_22 = arith.constant 16 : i32
    %111 = vector.broadcast %c16_i32_22 : i32 to vector<1x256xi32>
    %112 = arith.addi %5, %111 : vector<1x256xi32>
    %c256_i32_23 = arith.constant 256 : i32
    %113 = vector.broadcast %c256_i32_23 : i32 to vector<1x256xi32>
    %114 = arith.cmpi slt, %112, %113 : vector<1x256xi32>
    %115 = arith.andi %110, %114 : vector<1x256xi1>
    %cst_24 = arith.constant 0.000000e+00 : f32
    %116 = vector.broadcast %cst_24 : f32 to vector<1x256xf32>
    %117 = arith.select %115, %106, %116 : vector<1x256xi1>, vector<1x256xf32>
    %c224_i32_25 = arith.constant 224 : i32
    %118 = tpu.dynamic_rotate %3 by %c224_i32_25 dim 1 : vector<1x256xf32>, i32 -> vector<1x256xf32>
    %c32_i32_26 = arith.constant 32 : i32
    %119 = vector.broadcast %c32_i32_26 : i32 to vector<1x256xi32>
    %120 = arith.addi %5, %119 : vector<1x256xi32>
    %c0_i32_27 = arith.constant 0 : i32
    %121 = vector.broadcast %c0_i32_27 : i32 to vector<1x256xi32>
    %122 = arith.cmpi sge, %120, %121 : vector<1x256xi32>
    %c32_i32_28 = arith.constant 32 : i32
    %123 = vector.broadcast %c32_i32_28 : i32 to vector<1x256xi32>
    %124 = arith.addi %5, %123 : vector<1x256xi32>
    %c256_i32_29 = arith.constant 256 : i32
    %125 = vector.broadcast %c256_i32_29 : i32 to vector<1x256xi32>
    %126 = arith.cmpi slt, %124, %125 : vector<1x256xi32>
    %127 = arith.andi %122, %126 : vector<1x256xi1>
    %cst_30 = arith.constant 0.000000e+00 : f32
    %128 = vector.broadcast %cst_30 : f32 to vector<1x256xf32>
    %129 = arith.select %127, %118, %128 : vector<1x256xi1>, vector<1x256xf32>
    %c208_i32_31 = arith.constant 208 : i32
    %130 = tpu.dynamic_rotate %3 by %c208_i32_31 dim 1 : vector<1x256xf32>, i32 -> vector<1x256xf32>
    %c48_i32_32 = arith.constant 48 : i32
    %131 = vector.broadcast %c48_i32_32 : i32 to vector<1x256xi32>
    %132 = arith.addi %5, %131 : vector<1x256xi32>
    %c0_i32_33 = arith.constant 0 : i32
    %133 = vector.broadcast %c0_i32_33 : i32 to vector<1x256xi32>
    %134 = arith.cmpi sge, %132, %133 : vector<1x256xi32>
    %c48_i32_34 = arith.constant 48 : i32
    %135 = vector.broadcast %c48_i32_34 : i32 to vector<1x256xi32>
    %136 = arith.addi %5, %135 : vector<1x256xi32>
    %c256_i32_35 = arith.constant 256 : i32
    %137 = vector.broadcast %c256_i32_35 : i32 to vector<1x256xi32>
    %138 = arith.cmpi slt, %136, %137 : vector<1x256xi32>
    %139 = arith.andi %134, %138 : vector<1x256xi1>
    %cst_36 = arith.constant 0.000000e+00 : f32
    %140 = vector.broadcast %cst_36 : f32 to vector<1x256xf32>
    %141 = arith.select %139, %130, %140 : vector<1x256xi1>, vector<1x256xf32>
    %c48_i32_37 = arith.constant 48 : i32
    %142 = tpu.dynamic_rotate %4 by %c48_i32_37 dim 1 : vector<1x256xf32>, i32 -> vector<1x256xf32>
    %c-48_i32_38 = arith.constant -48 : i32
    %143 = vector.broadcast %c-48_i32_38 : i32 to vector<1x256xi32>
    %144 = arith.addi %5, %143 : vector<1x256xi32>
    %c0_i32_39 = arith.constant 0 : i32
    %145 = vector.broadcast %c0_i32_39 : i32 to vector<1x256xi32>
    %146 = arith.cmpi sge, %144, %145 : vector<1x256xi32>
    %c-48_i32_40 = arith.constant -48 : i32
    %147 = vector.broadcast %c-48_i32_40 : i32 to vector<1x256xi32>
    %148 = arith.addi %5, %147 : vector<1x256xi32>
    %c256_i32_41 = arith.constant 256 : i32
    %149 = vector.broadcast %c256_i32_41 : i32 to vector<1x256xi32>
    %150 = arith.cmpi slt, %148, %149 : vector<1x256xi32>
    %151 = arith.andi %146, %150 : vector<1x256xi1>
    %cst_42 = arith.constant 0.000000e+00 : f32
    %152 = vector.broadcast %cst_42 : f32 to vector<1x256xf32>
    %153 = arith.select %151, %142, %152 : vector<1x256xi1>, vector<1x256xf32>
    %c32_i32_43 = arith.constant 32 : i32
    %154 = tpu.dynamic_rotate %4 by %c32_i32_43 dim 1 : vector<1x256xf32>, i32 -> vector<1x256xf32>
    %c-32_i32_44 = arith.constant -32 : i32
    %155 = vector.broadcast %c-32_i32_44 : i32 to vector<1x256xi32>
    %156 = arith.addi %5, %155 : vector<1x256xi32>
    %c0_i32_45 = arith.constant 0 : i32
    %157 = vector.broadcast %c0_i32_45 : i32 to vector<1x256xi32>
    %158 = arith.cmpi sge, %156, %157 : vector<1x256xi32>
    %c-32_i32_46 = arith.constant -32 : i32
    %159 = vector.broadcast %c-32_i32_46 : i32 to vector<1x256xi32>
    %160 = arith.addi %5, %159 : vector<1x256xi32>
    %c256_i32_47 = arith.constant 256 : i32
    %161 = vector.broadcast %c256_i32_47 : i32 to vector<1x256xi32>
    %162 = arith.cmpi slt, %160, %161 : vector<1x256xi32>
    %163 = arith.andi %158, %162 : vector<1x256xi1>
    %cst_48 = arith.constant 0.000000e+00 : f32
    %164 = vector.broadcast %cst_48 : f32 to vector<1x256xf32>
    %165 = arith.select %163, %154, %164 : vector<1x256xi1>, vector<1x256xf32>
    %c16_i32_49 = arith.constant 16 : i32
    %166 = tpu.dynamic_rotate %4 by %c16_i32_49 dim 1 : vector<1x256xf32>, i32 -> vector<1x256xf32>
    %c-16_i32_50 = arith.constant -16 : i32
    %167 = vector.broadcast %c-16_i32_50 : i32 to vector<1x256xi32>
    %168 = arith.addi %5, %167 : vector<1x256xi32>
    %c0_i32_51 = arith.constant 0 : i32
    %169 = vector.broadcast %c0_i32_51 : i32 to vector<1x256xi32>
    %170 = arith.cmpi sge, %168, %169 : vector<1x256xi32>
    %c-16_i32_52 = arith.constant -16 : i32
    %171 = vector.broadcast %c-16_i32_52 : i32 to vector<1x256xi32>
    %172 = arith.addi %5, %171 : vector<1x256xi32>
    %c256_i32_53 = arith.constant 256 : i32
    %173 = vector.broadcast %c256_i32_53 : i32 to vector<1x256xi32>
    %174 = arith.cmpi slt, %172, %173 : vector<1x256xi32>
    %175 = arith.andi %170, %174 : vector<1x256xi1>
    %cst_54 = arith.constant 0.000000e+00 : f32
    %176 = vector.broadcast %cst_54 : f32 to vector<1x256xf32>
    %177 = arith.select %175, %166, %176 : vector<1x256xi1>, vector<1x256xf32>
    %c240_i32_55 = arith.constant 240 : i32
    %178 = tpu.dynamic_rotate %4 by %c240_i32_55 dim 1 : vector<1x256xf32>, i32 -> vector<1x256xf32>
    %c16_i32_56 = arith.constant 16 : i32
    %179 = vector.broadcast %c16_i32_56 : i32 to vector<1x256xi32>
    %180 = arith.addi %5, %179 : vector<1x256xi32>
    %c0_i32_57 = arith.constant 0 : i32
    %181 = vector.broadcast %c0_i32_57 : i32 to vector<1x256xi32>
    %182 = arith.cmpi sge, %180, %181 : vector<1x256xi32>
    %c16_i32_58 = arith.constant 16 : i32
    %183 = vector.broadcast %c16_i32_58 : i32 to vector<1x256xi32>
    %184 = arith.addi %5, %183 : vector<1x256xi32>
    %c256_i32_59 = arith.constant 256 : i32
    %185 = vector.broadcast %c256_i32_59 : i32 to vector<1x256xi32>
    %186 = arith.cmpi slt, %184, %185 : vector<1x256xi32>
    %187 = arith.andi %182, %186 : vector<1x256xi1>
    %cst_60 = arith.constant 0.000000e+00 : f32
    %188 = vector.broadcast %cst_60 : f32 to vector<1x256xf32>
    %189 = arith.select %187, %178, %188 : vector<1x256xi1>, vector<1x256xf32>
    %c224_i32_61 = arith.constant 224 : i32
    %190 = tpu.dynamic_rotate %4 by %c224_i32_61 dim 1 : vector<1x256xf32>, i32 -> vector<1x256xf32>
    %c32_i32_62 = arith.constant 32 : i32
    %191 = vector.broadcast %c32_i32_62 : i32 to vector<1x256xi32>
    %192 = arith.addi %5, %191 : vector<1x256xi32>
    %c0_i32_63 = arith.constant 0 : i32
    %193 = vector.broadcast %c0_i32_63 : i32 to vector<1x256xi32>
    %194 = arith.cmpi sge, %192, %193 : vector<1x256xi32>
    %c32_i32_64 = arith.constant 32 : i32
    %195 = vector.broadcast %c32_i32_64 : i32 to vector<1x256xi32>
    %196 = arith.addi %5, %195 : vector<1x256xi32>
    %c256_i32_65 = arith.constant 256 : i32
    %197 = vector.broadcast %c256_i32_65 : i32 to vector<1x256xi32>
    %198 = arith.cmpi slt, %196, %197 : vector<1x256xi32>
    %199 = arith.andi %194, %198 : vector<1x256xi1>
    %cst_66 = arith.constant 0.000000e+00 : f32
    %200 = vector.broadcast %cst_66 : f32 to vector<1x256xf32>
    %201 = arith.select %199, %190, %200 : vector<1x256xi1>, vector<1x256xf32>
    %c208_i32_67 = arith.constant 208 : i32
    %202 = tpu.dynamic_rotate %4 by %c208_i32_67 dim 1 : vector<1x256xf32>, i32 -> vector<1x256xf32>
    %c48_i32_68 = arith.constant 48 : i32
    %203 = vector.broadcast %c48_i32_68 : i32 to vector<1x256xi32>
    %204 = arith.addi %5, %203 : vector<1x256xi32>
    %c0_i32_69 = arith.constant 0 : i32
    %205 = vector.broadcast %c0_i32_69 : i32 to vector<1x256xi32>
    %206 = arith.cmpi sge, %204, %205 : vector<1x256xi32>
    %c48_i32_70 = arith.constant 48 : i32
    %207 = vector.broadcast %c48_i32_70 : i32 to vector<1x256xi32>
    %208 = arith.addi %5, %207 : vector<1x256xi32>
    %c256_i32_71 = arith.constant 256 : i32
    %209 = vector.broadcast %c256_i32_71 : i32 to vector<1x256xi32>
    %210 = arith.cmpi slt, %208, %209 : vector<1x256xi32>
    %211 = arith.andi %206, %210 : vector<1x256xi1>
    %cst_72 = arith.constant 0.000000e+00 : f32
    %212 = vector.broadcast %cst_72 : f32 to vector<1x256xf32>
    %213 = arith.select %211, %202, %212 : vector<1x256xi1>, vector<1x256xf32>
    %c0_73 = arith.constant 0 : index
    %214 = memref.load %arg1[%c0_73] : memref<98xf32, #tpu.memory_space<smem>>
    %215 = vector.broadcast %214 : f32 to vector<1x256xf32>
    %216 = arith.mulf %215, %81 : vector<1x256xf32>
    %c7 = arith.constant 7 : index
    %217 = memref.load %arg1[%c7] : memref<98xf32, #tpu.memory_space<smem>>
    %218 = vector.broadcast %217 : f32 to vector<1x256xf32>
    %219 = arith.mulf %218, %93 : vector<1x256xf32>
    %220 = arith.addf %216, %219 : vector<1x256xf32>
    %c14 = arith.constant 14 : index
    %221 = memref.load %arg1[%c14] : memref<98xf32, #tpu.memory_space<smem>>
    %222 = vector.broadcast %221 : f32 to vector<1x256xf32>
    %223 = arith.mulf %222, %105 : vector<1x256xf32>
    %224 = arith.addf %220, %223 : vector<1x256xf32>
    %c21 = arith.constant 21 : index
    %225 = memref.load %arg1[%c21] : memref<98xf32, #tpu.memory_space<smem>>
    %226 = vector.broadcast %225 : f32 to vector<1x256xf32>
    %227 = arith.mulf %226, %3 : vector<1x256xf32>
    %228 = arith.addf %224, %227 : vector<1x256xf32>
    %c28 = arith.constant 28 : index
    %229 = memref.load %arg1[%c28] : memref<98xf32, #tpu.memory_space<smem>>
    %230 = vector.broadcast %229 : f32 to vector<1x256xf32>
    %231 = arith.mulf %230, %117 : vector<1x256xf32>
    %232 = arith.addf %228, %231 : vector<1x256xf32>
    %c35 = arith.constant 35 : index
    %233 = memref.load %arg1[%c35] : memref<98xf32, #tpu.memory_space<smem>>
    %234 = vector.broadcast %233 : f32 to vector<1x256xf32>
    %235 = arith.mulf %234, %129 : vector<1x256xf32>
    %236 = arith.addf %232, %235 : vector<1x256xf32>
    %c42 = arith.constant 42 : index
    %237 = memref.load %arg1[%c42] : memref<98xf32, #tpu.memory_space<smem>>
    %238 = vector.broadcast %237 : f32 to vector<1x256xf32>
    %239 = arith.mulf %238, %141 : vector<1x256xf32>
    %240 = arith.addf %236, %239 : vector<1x256xf32>
    %c49 = arith.constant 49 : index
    %241 = memref.load %arg1[%c49] : memref<98xf32, #tpu.memory_space<smem>>
    %242 = vector.broadcast %241 : f32 to vector<1x256xf32>
    %243 = arith.mulf %242, %153 : vector<1x256xf32>
    %244 = arith.addf %240, %243 : vector<1x256xf32>
    %c56 = arith.constant 56 : index
    %245 = memref.load %arg1[%c56] : memref<98xf32, #tpu.memory_space<smem>>
    %246 = vector.broadcast %245 : f32 to vector<1x256xf32>
    %247 = arith.mulf %246, %165 : vector<1x256xf32>
    %248 = arith.addf %244, %247 : vector<1x256xf32>
    %c63 = arith.constant 63 : index
    %249 = memref.load %arg1[%c63] : memref<98xf32, #tpu.memory_space<smem>>
    %250 = vector.broadcast %249 : f32 to vector<1x256xf32>
    %251 = arith.mulf %250, %177 : vector<1x256xf32>
    %252 = arith.addf %248, %251 : vector<1x256xf32>
    %c70 = arith.constant 70 : index
    %253 = memref.load %arg1[%c70] : memref<98xf32, #tpu.memory_space<smem>>
    %254 = vector.broadcast %253 : f32 to vector<1x256xf32>
    %255 = arith.mulf %254, %4 : vector<1x256xf32>
    %256 = arith.addf %252, %255 : vector<1x256xf32>
    %c77 = arith.constant 77 : index
    %257 = memref.load %arg1[%c77] : memref<98xf32, #tpu.memory_space<smem>>
    %258 = vector.broadcast %257 : f32 to vector<1x256xf32>
    %259 = arith.mulf %258, %189 : vector<1x256xf32>
    %260 = arith.addf %256, %259 : vector<1x256xf32>
    %c84 = arith.constant 84 : index
    %261 = memref.load %arg1[%c84] : memref<98xf32, #tpu.memory_space<smem>>
    %262 = vector.broadcast %261 : f32 to vector<1x256xf32>
    %263 = arith.mulf %262, %201 : vector<1x256xf32>
    %264 = arith.addf %260, %263 : vector<1x256xf32>
    %c91 = arith.constant 91 : index
    %265 = memref.load %arg1[%c91] : memref<98xf32, #tpu.memory_space<smem>>
    %266 = vector.broadcast %265 : f32 to vector<1x256xf32>
    %267 = arith.mulf %266, %213 : vector<1x256xf32>
    %268 = arith.addf %264, %267 : vector<1x256xf32>
    %c3_i32 = arith.constant 3 : i32
    %269 = tpu.dynamic_rotate %268 by %c3_i32 dim 1 : vector<1x256xf32>, i32 -> vector<1x256xf32>
    %c-3_i32 = arith.constant -3 : i32
    %270 = vector.broadcast %c-3_i32 : i32 to vector<1x256xi32>
    %271 = arith.addi %69, %270 : vector<1x256xi32>
    %c0_i32_74 = arith.constant 0 : i32
    %272 = vector.broadcast %c0_i32_74 : i32 to vector<1x256xi32>
    %273 = arith.cmpi sge, %271, %272 : vector<1x256xi32>
    %c-3_i32_75 = arith.constant -3 : i32
    %274 = vector.broadcast %c-3_i32_75 : i32 to vector<1x256xi32>
    %275 = arith.addi %69, %274 : vector<1x256xi32>
    %c16_i32_76 = arith.constant 16 : i32
    %276 = vector.broadcast %c16_i32_76 : i32 to vector<1x256xi32>
    %277 = arith.cmpi slt, %275, %276 : vector<1x256xi32>
    %278 = arith.andi %273, %277 : vector<1x256xi1>
    %cst_77 = arith.constant 0.000000e+00 : f32
    %279 = vector.broadcast %cst_77 : f32 to vector<1x256xf32>
    %280 = arith.select %278, %269, %279 : vector<1x256xi1>, vector<1x256xf32>
    %c1 = arith.constant 1 : index
    %281 = memref.load %arg1[%c1] : memref<98xf32, #tpu.memory_space<smem>>
    %282 = vector.broadcast %281 : f32 to vector<1x256xf32>
    %283 = arith.mulf %282, %81 : vector<1x256xf32>
    %c8 = arith.constant 8 : index
    %284 = memref.load %arg1[%c8] : memref<98xf32, #tpu.memory_space<smem>>
    %285 = vector.broadcast %284 : f32 to vector<1x256xf32>
    %286 = arith.mulf %285, %93 : vector<1x256xf32>
    %287 = arith.addf %283, %286 : vector<1x256xf32>
    %c15 = arith.constant 15 : index
    %288 = memref.load %arg1[%c15] : memref<98xf32, #tpu.memory_space<smem>>
    %289 = vector.broadcast %288 : f32 to vector<1x256xf32>
    %290 = arith.mulf %289, %105 : vector<1x256xf32>
    %291 = arith.addf %287, %290 : vector<1x256xf32>
    %c22 = arith.constant 22 : index
    %292 = memref.load %arg1[%c22] : memref<98xf32, #tpu.memory_space<smem>>
    %293 = vector.broadcast %292 : f32 to vector<1x256xf32>
    %294 = arith.mulf %293, %3 : vector<1x256xf32>
    %295 = arith.addf %291, %294 : vector<1x256xf32>
    %c29 = arith.constant 29 : index
    %296 = memref.load %arg1[%c29] : memref<98xf32, #tpu.memory_space<smem>>
    %297 = vector.broadcast %296 : f32 to vector<1x256xf32>
    %298 = arith.mulf %297, %117 : vector<1x256xf32>
    %299 = arith.addf %295, %298 : vector<1x256xf32>
    %c36 = arith.constant 36 : index
    %300 = memref.load %arg1[%c36] : memref<98xf32, #tpu.memory_space<smem>>
    %301 = vector.broadcast %300 : f32 to vector<1x256xf32>
    %302 = arith.mulf %301, %129 : vector<1x256xf32>
    %303 = arith.addf %299, %302 : vector<1x256xf32>
    %c43 = arith.constant 43 : index
    %304 = memref.load %arg1[%c43] : memref<98xf32, #tpu.memory_space<smem>>
    %305 = vector.broadcast %304 : f32 to vector<1x256xf32>
    %306 = arith.mulf %305, %141 : vector<1x256xf32>
    %307 = arith.addf %303, %306 : vector<1x256xf32>
    %c50 = arith.constant 50 : index
    %308 = memref.load %arg1[%c50] : memref<98xf32, #tpu.memory_space<smem>>
    %309 = vector.broadcast %308 : f32 to vector<1x256xf32>
    %310 = arith.mulf %309, %153 : vector<1x256xf32>
    %311 = arith.addf %307, %310 : vector<1x256xf32>
    %c57 = arith.constant 57 : index
    %312 = memref.load %arg1[%c57] : memref<98xf32, #tpu.memory_space<smem>>
    %313 = vector.broadcast %312 : f32 to vector<1x256xf32>
    %314 = arith.mulf %313, %165 : vector<1x256xf32>
    %315 = arith.addf %311, %314 : vector<1x256xf32>
    %c64 = arith.constant 64 : index
    %316 = memref.load %arg1[%c64] : memref<98xf32, #tpu.memory_space<smem>>
    %317 = vector.broadcast %316 : f32 to vector<1x256xf32>
    %318 = arith.mulf %317, %177 : vector<1x256xf32>
    %319 = arith.addf %315, %318 : vector<1x256xf32>
    %c71 = arith.constant 71 : index
    %320 = memref.load %arg1[%c71] : memref<98xf32, #tpu.memory_space<smem>>
    %321 = vector.broadcast %320 : f32 to vector<1x256xf32>
    %322 = arith.mulf %321, %4 : vector<1x256xf32>
    %323 = arith.addf %319, %322 : vector<1x256xf32>
    %c78 = arith.constant 78 : index
    %324 = memref.load %arg1[%c78] : memref<98xf32, #tpu.memory_space<smem>>
    %325 = vector.broadcast %324 : f32 to vector<1x256xf32>
    %326 = arith.mulf %325, %189 : vector<1x256xf32>
    %327 = arith.addf %323, %326 : vector<1x256xf32>
    %c85 = arith.constant 85 : index
    %328 = memref.load %arg1[%c85] : memref<98xf32, #tpu.memory_space<smem>>
    %329 = vector.broadcast %328 : f32 to vector<1x256xf32>
    %330 = arith.mulf %329, %201 : vector<1x256xf32>
    %331 = arith.addf %327, %330 : vector<1x256xf32>
    %c92 = arith.constant 92 : index
    %332 = memref.load %arg1[%c92] : memref<98xf32, #tpu.memory_space<smem>>
    %333 = vector.broadcast %332 : f32 to vector<1x256xf32>
    %334 = arith.mulf %333, %213 : vector<1x256xf32>
    %335 = arith.addf %331, %334 : vector<1x256xf32>
    %c2_i32 = arith.constant 2 : i32
    %336 = tpu.dynamic_rotate %335 by %c2_i32 dim 1 : vector<1x256xf32>, i32 -> vector<1x256xf32>
    %c-2_i32 = arith.constant -2 : i32
    %337 = vector.broadcast %c-2_i32 : i32 to vector<1x256xi32>
    %338 = arith.addi %69, %337 : vector<1x256xi32>
    %c0_i32_78 = arith.constant 0 : i32
    %339 = vector.broadcast %c0_i32_78 : i32 to vector<1x256xi32>
    %340 = arith.cmpi sge, %338, %339 : vector<1x256xi32>
    %c-2_i32_79 = arith.constant -2 : i32
    %341 = vector.broadcast %c-2_i32_79 : i32 to vector<1x256xi32>
    %342 = arith.addi %69, %341 : vector<1x256xi32>
    %c16_i32_80 = arith.constant 16 : i32
    %343 = vector.broadcast %c16_i32_80 : i32 to vector<1x256xi32>
    %344 = arith.cmpi slt, %342, %343 : vector<1x256xi32>
    %345 = arith.andi %340, %344 : vector<1x256xi1>
    %cst_81 = arith.constant 0.000000e+00 : f32
    %346 = vector.broadcast %cst_81 : f32 to vector<1x256xf32>
    %347 = arith.select %345, %336, %346 : vector<1x256xi1>, vector<1x256xf32>
    %348 = arith.addf %280, %347 : vector<1x256xf32>
    %c2 = arith.constant 2 : index
    %349 = memref.load %arg1[%c2] : memref<98xf32, #tpu.memory_space<smem>>
    %350 = vector.broadcast %349 : f32 to vector<1x256xf32>
    %351 = arith.mulf %350, %81 : vector<1x256xf32>
    %c9 = arith.constant 9 : index
    %352 = memref.load %arg1[%c9] : memref<98xf32, #tpu.memory_space<smem>>
    %353 = vector.broadcast %352 : f32 to vector<1x256xf32>
    %354 = arith.mulf %353, %93 : vector<1x256xf32>
    %355 = arith.addf %351, %354 : vector<1x256xf32>
    %c16 = arith.constant 16 : index
    %356 = memref.load %arg1[%c16] : memref<98xf32, #tpu.memory_space<smem>>
    %357 = vector.broadcast %356 : f32 to vector<1x256xf32>
    %358 = arith.mulf %357, %105 : vector<1x256xf32>
    %359 = arith.addf %355, %358 : vector<1x256xf32>
    %c23 = arith.constant 23 : index
    %360 = memref.load %arg1[%c23] : memref<98xf32, #tpu.memory_space<smem>>
    %361 = vector.broadcast %360 : f32 to vector<1x256xf32>
    %362 = arith.mulf %361, %3 : vector<1x256xf32>
    %363 = arith.addf %359, %362 : vector<1x256xf32>
    %c30 = arith.constant 30 : index
    %364 = memref.load %arg1[%c30] : memref<98xf32, #tpu.memory_space<smem>>
    %365 = vector.broadcast %364 : f32 to vector<1x256xf32>
    %366 = arith.mulf %365, %117 : vector<1x256xf32>
    %367 = arith.addf %363, %366 : vector<1x256xf32>
    %c37 = arith.constant 37 : index
    %368 = memref.load %arg1[%c37] : memref<98xf32, #tpu.memory_space<smem>>
    %369 = vector.broadcast %368 : f32 to vector<1x256xf32>
    %370 = arith.mulf %369, %129 : vector<1x256xf32>
    %371 = arith.addf %367, %370 : vector<1x256xf32>
    %c44 = arith.constant 44 : index
    %372 = memref.load %arg1[%c44] : memref<98xf32, #tpu.memory_space<smem>>
    %373 = vector.broadcast %372 : f32 to vector<1x256xf32>
    %374 = arith.mulf %373, %141 : vector<1x256xf32>
    %375 = arith.addf %371, %374 : vector<1x256xf32>
    %c51 = arith.constant 51 : index
    %376 = memref.load %arg1[%c51] : memref<98xf32, #tpu.memory_space<smem>>
    %377 = vector.broadcast %376 : f32 to vector<1x256xf32>
    %378 = arith.mulf %377, %153 : vector<1x256xf32>
    %379 = arith.addf %375, %378 : vector<1x256xf32>
    %c58 = arith.constant 58 : index
    %380 = memref.load %arg1[%c58] : memref<98xf32, #tpu.memory_space<smem>>
    %381 = vector.broadcast %380 : f32 to vector<1x256xf32>
    %382 = arith.mulf %381, %165 : vector<1x256xf32>
    %383 = arith.addf %379, %382 : vector<1x256xf32>
    %c65 = arith.constant 65 : index
    %384 = memref.load %arg1[%c65] : memref<98xf32, #tpu.memory_space<smem>>
    %385 = vector.broadcast %384 : f32 to vector<1x256xf32>
    %386 = arith.mulf %385, %177 : vector<1x256xf32>
    %387 = arith.addf %383, %386 : vector<1x256xf32>
    %c72 = arith.constant 72 : index
    %388 = memref.load %arg1[%c72] : memref<98xf32, #tpu.memory_space<smem>>
    %389 = vector.broadcast %388 : f32 to vector<1x256xf32>
    %390 = arith.mulf %389, %4 : vector<1x256xf32>
    %391 = arith.addf %387, %390 : vector<1x256xf32>
    %c79 = arith.constant 79 : index
    %392 = memref.load %arg1[%c79] : memref<98xf32, #tpu.memory_space<smem>>
    %393 = vector.broadcast %392 : f32 to vector<1x256xf32>
    %394 = arith.mulf %393, %189 : vector<1x256xf32>
    %395 = arith.addf %391, %394 : vector<1x256xf32>
    %c86 = arith.constant 86 : index
    %396 = memref.load %arg1[%c86] : memref<98xf32, #tpu.memory_space<smem>>
    %397 = vector.broadcast %396 : f32 to vector<1x256xf32>
    %398 = arith.mulf %397, %201 : vector<1x256xf32>
    %399 = arith.addf %395, %398 : vector<1x256xf32>
    %c93 = arith.constant 93 : index
    %400 = memref.load %arg1[%c93] : memref<98xf32, #tpu.memory_space<smem>>
    %401 = vector.broadcast %400 : f32 to vector<1x256xf32>
    %402 = arith.mulf %401, %213 : vector<1x256xf32>
    %403 = arith.addf %399, %402 : vector<1x256xf32>
    %c1_i32 = arith.constant 1 : i32
    %404 = tpu.dynamic_rotate %403 by %c1_i32 dim 1 : vector<1x256xf32>, i32 -> vector<1x256xf32>
    %c-1_i32 = arith.constant -1 : i32
    %405 = vector.broadcast %c-1_i32 : i32 to vector<1x256xi32>
    %406 = arith.addi %69, %405 : vector<1x256xi32>
    %c0_i32_82 = arith.constant 0 : i32
    %407 = vector.broadcast %c0_i32_82 : i32 to vector<1x256xi32>
    %408 = arith.cmpi sge, %406, %407 : vector<1x256xi32>
    %c-1_i32_83 = arith.constant -1 : i32
    %409 = vector.broadcast %c-1_i32_83 : i32 to vector<1x256xi32>
    %410 = arith.addi %69, %409 : vector<1x256xi32>
    %c16_i32_84 = arith.constant 16 : i32
    %411 = vector.broadcast %c16_i32_84 : i32 to vector<1x256xi32>
    %412 = arith.cmpi slt, %410, %411 : vector<1x256xi32>
    %413 = arith.andi %408, %412 : vector<1x256xi1>
    %cst_85 = arith.constant 0.000000e+00 : f32
    %414 = vector.broadcast %cst_85 : f32 to vector<1x256xf32>
    %415 = arith.select %413, %404, %414 : vector<1x256xi1>, vector<1x256xf32>
    %416 = arith.addf %348, %415 : vector<1x256xf32>
    %c3 = arith.constant 3 : index
    %417 = memref.load %arg1[%c3] : memref<98xf32, #tpu.memory_space<smem>>
    %418 = vector.broadcast %417 : f32 to vector<1x256xf32>
    %419 = arith.mulf %418, %81 : vector<1x256xf32>
    %c10 = arith.constant 10 : index
    %420 = memref.load %arg1[%c10] : memref<98xf32, #tpu.memory_space<smem>>
    %421 = vector.broadcast %420 : f32 to vector<1x256xf32>
    %422 = arith.mulf %421, %93 : vector<1x256xf32>
    %423 = arith.addf %419, %422 : vector<1x256xf32>
    %c17 = arith.constant 17 : index
    %424 = memref.load %arg1[%c17] : memref<98xf32, #tpu.memory_space<smem>>
    %425 = vector.broadcast %424 : f32 to vector<1x256xf32>
    %426 = arith.mulf %425, %105 : vector<1x256xf32>
    %427 = arith.addf %423, %426 : vector<1x256xf32>
    %c24 = arith.constant 24 : index
    %428 = memref.load %arg1[%c24] : memref<98xf32, #tpu.memory_space<smem>>
    %429 = vector.broadcast %428 : f32 to vector<1x256xf32>
    %430 = arith.mulf %429, %3 : vector<1x256xf32>
    %431 = arith.addf %427, %430 : vector<1x256xf32>
    %c31 = arith.constant 31 : index
    %432 = memref.load %arg1[%c31] : memref<98xf32, #tpu.memory_space<smem>>
    %433 = vector.broadcast %432 : f32 to vector<1x256xf32>
    %434 = arith.mulf %433, %117 : vector<1x256xf32>
    %435 = arith.addf %431, %434 : vector<1x256xf32>
    %c38 = arith.constant 38 : index
    %436 = memref.load %arg1[%c38] : memref<98xf32, #tpu.memory_space<smem>>
    %437 = vector.broadcast %436 : f32 to vector<1x256xf32>
    %438 = arith.mulf %437, %129 : vector<1x256xf32>
    %439 = arith.addf %435, %438 : vector<1x256xf32>
    %c45 = arith.constant 45 : index
    %440 = memref.load %arg1[%c45] : memref<98xf32, #tpu.memory_space<smem>>
    %441 = vector.broadcast %440 : f32 to vector<1x256xf32>
    %442 = arith.mulf %441, %141 : vector<1x256xf32>
    %443 = arith.addf %439, %442 : vector<1x256xf32>
    %c52 = arith.constant 52 : index
    %444 = memref.load %arg1[%c52] : memref<98xf32, #tpu.memory_space<smem>>
    %445 = vector.broadcast %444 : f32 to vector<1x256xf32>
    %446 = arith.mulf %445, %153 : vector<1x256xf32>
    %447 = arith.addf %443, %446 : vector<1x256xf32>
    %c59 = arith.constant 59 : index
    %448 = memref.load %arg1[%c59] : memref<98xf32, #tpu.memory_space<smem>>
    %449 = vector.broadcast %448 : f32 to vector<1x256xf32>
    %450 = arith.mulf %449, %165 : vector<1x256xf32>
    %451 = arith.addf %447, %450 : vector<1x256xf32>
    %c66 = arith.constant 66 : index
    %452 = memref.load %arg1[%c66] : memref<98xf32, #tpu.memory_space<smem>>
    %453 = vector.broadcast %452 : f32 to vector<1x256xf32>
    %454 = arith.mulf %453, %177 : vector<1x256xf32>
    %455 = arith.addf %451, %454 : vector<1x256xf32>
    %c73 = arith.constant 73 : index
    %456 = memref.load %arg1[%c73] : memref<98xf32, #tpu.memory_space<smem>>
    %457 = vector.broadcast %456 : f32 to vector<1x256xf32>
    %458 = arith.mulf %457, %4 : vector<1x256xf32>
    %459 = arith.addf %455, %458 : vector<1x256xf32>
    %c80 = arith.constant 80 : index
    %460 = memref.load %arg1[%c80] : memref<98xf32, #tpu.memory_space<smem>>
    %461 = vector.broadcast %460 : f32 to vector<1x256xf32>
    %462 = arith.mulf %461, %189 : vector<1x256xf32>
    %463 = arith.addf %459, %462 : vector<1x256xf32>
    %c87 = arith.constant 87 : index
    %464 = memref.load %arg1[%c87] : memref<98xf32, #tpu.memory_space<smem>>
    %465 = vector.broadcast %464 : f32 to vector<1x256xf32>
    %466 = arith.mulf %465, %201 : vector<1x256xf32>
    %467 = arith.addf %463, %466 : vector<1x256xf32>
    %c94 = arith.constant 94 : index
    %468 = memref.load %arg1[%c94] : memref<98xf32, #tpu.memory_space<smem>>
    %469 = vector.broadcast %468 : f32 to vector<1x256xf32>
    %470 = arith.mulf %469, %213 : vector<1x256xf32>
    %471 = arith.addf %467, %470 : vector<1x256xf32>
    %472 = arith.addf %416, %471 : vector<1x256xf32>
    %c4 = arith.constant 4 : index
    %473 = memref.load %arg1[%c4] : memref<98xf32, #tpu.memory_space<smem>>
    %474 = vector.broadcast %473 : f32 to vector<1x256xf32>
    %475 = arith.mulf %474, %81 : vector<1x256xf32>
    %c11 = arith.constant 11 : index
    %476 = memref.load %arg1[%c11] : memref<98xf32, #tpu.memory_space<smem>>
    %477 = vector.broadcast %476 : f32 to vector<1x256xf32>
    %478 = arith.mulf %477, %93 : vector<1x256xf32>
    %479 = arith.addf %475, %478 : vector<1x256xf32>
    %c18 = arith.constant 18 : index
    %480 = memref.load %arg1[%c18] : memref<98xf32, #tpu.memory_space<smem>>
    %481 = vector.broadcast %480 : f32 to vector<1x256xf32>
    %482 = arith.mulf %481, %105 : vector<1x256xf32>
    %483 = arith.addf %479, %482 : vector<1x256xf32>
    %c25 = arith.constant 25 : index
    %484 = memref.load %arg1[%c25] : memref<98xf32, #tpu.memory_space<smem>>
    %485 = vector.broadcast %484 : f32 to vector<1x256xf32>
    %486 = arith.mulf %485, %3 : vector<1x256xf32>
    %487 = arith.addf %483, %486 : vector<1x256xf32>
    %c32 = arith.constant 32 : index
    %488 = memref.load %arg1[%c32] : memref<98xf32, #tpu.memory_space<smem>>
    %489 = vector.broadcast %488 : f32 to vector<1x256xf32>
    %490 = arith.mulf %489, %117 : vector<1x256xf32>
    %491 = arith.addf %487, %490 : vector<1x256xf32>
    %c39 = arith.constant 39 : index
    %492 = memref.load %arg1[%c39] : memref<98xf32, #tpu.memory_space<smem>>
    %493 = vector.broadcast %492 : f32 to vector<1x256xf32>
    %494 = arith.mulf %493, %129 : vector<1x256xf32>
    %495 = arith.addf %491, %494 : vector<1x256xf32>
    %c46 = arith.constant 46 : index
    %496 = memref.load %arg1[%c46] : memref<98xf32, #tpu.memory_space<smem>>
    %497 = vector.broadcast %496 : f32 to vector<1x256xf32>
    %498 = arith.mulf %497, %141 : vector<1x256xf32>
    %499 = arith.addf %495, %498 : vector<1x256xf32>
    %c53 = arith.constant 53 : index
    %500 = memref.load %arg1[%c53] : memref<98xf32, #tpu.memory_space<smem>>
    %501 = vector.broadcast %500 : f32 to vector<1x256xf32>
    %502 = arith.mulf %501, %153 : vector<1x256xf32>
    %503 = arith.addf %499, %502 : vector<1x256xf32>
    %c60 = arith.constant 60 : index
    %504 = memref.load %arg1[%c60] : memref<98xf32, #tpu.memory_space<smem>>
    %505 = vector.broadcast %504 : f32 to vector<1x256xf32>
    %506 = arith.mulf %505, %165 : vector<1x256xf32>
    %507 = arith.addf %503, %506 : vector<1x256xf32>
    %c67 = arith.constant 67 : index
    %508 = memref.load %arg1[%c67] : memref<98xf32, #tpu.memory_space<smem>>
    %509 = vector.broadcast %508 : f32 to vector<1x256xf32>
    %510 = arith.mulf %509, %177 : vector<1x256xf32>
    %511 = arith.addf %507, %510 : vector<1x256xf32>
    %c74 = arith.constant 74 : index
    %512 = memref.load %arg1[%c74] : memref<98xf32, #tpu.memory_space<smem>>
    %513 = vector.broadcast %512 : f32 to vector<1x256xf32>
    %514 = arith.mulf %513, %4 : vector<1x256xf32>
    %515 = arith.addf %511, %514 : vector<1x256xf32>
    %c81 = arith.constant 81 : index
    %516 = memref.load %arg1[%c81] : memref<98xf32, #tpu.memory_space<smem>>
    %517 = vector.broadcast %516 : f32 to vector<1x256xf32>
    %518 = arith.mulf %517, %189 : vector<1x256xf32>
    %519 = arith.addf %515, %518 : vector<1x256xf32>
    %c88 = arith.constant 88 : index
    %520 = memref.load %arg1[%c88] : memref<98xf32, #tpu.memory_space<smem>>
    %521 = vector.broadcast %520 : f32 to vector<1x256xf32>
    %522 = arith.mulf %521, %201 : vector<1x256xf32>
    %523 = arith.addf %519, %522 : vector<1x256xf32>
    %c95 = arith.constant 95 : index
    %524 = memref.load %arg1[%c95] : memref<98xf32, #tpu.memory_space<smem>>
    %525 = vector.broadcast %524 : f32 to vector<1x256xf32>
    %526 = arith.mulf %525, %213 : vector<1x256xf32>
    %527 = arith.addf %523, %526 : vector<1x256xf32>
    %c255_i32 = arith.constant 255 : i32
    %528 = tpu.dynamic_rotate %527 by %c255_i32 dim 1 : vector<1x256xf32>, i32 -> vector<1x256xf32>
    %c1_i32_86 = arith.constant 1 : i32
    %529 = vector.broadcast %c1_i32_86 : i32 to vector<1x256xi32>
    %530 = arith.addi %69, %529 : vector<1x256xi32>
    %c0_i32_87 = arith.constant 0 : i32
    %531 = vector.broadcast %c0_i32_87 : i32 to vector<1x256xi32>
    %532 = arith.cmpi sge, %530, %531 : vector<1x256xi32>
    %c1_i32_88 = arith.constant 1 : i32
    %533 = vector.broadcast %c1_i32_88 : i32 to vector<1x256xi32>
    %534 = arith.addi %69, %533 : vector<1x256xi32>
    %c16_i32_89 = arith.constant 16 : i32
    %535 = vector.broadcast %c16_i32_89 : i32 to vector<1x256xi32>
    %536 = arith.cmpi slt, %534, %535 : vector<1x256xi32>
    %537 = arith.andi %532, %536 : vector<1x256xi1>
    %cst_90 = arith.constant 0.000000e+00 : f32
    %538 = vector.broadcast %cst_90 : f32 to vector<1x256xf32>
    %539 = arith.select %537, %528, %538 : vector<1x256xi1>, vector<1x256xf32>
    %540 = arith.addf %472, %539 : vector<1x256xf32>
    %c5 = arith.constant 5 : index
    %541 = memref.load %arg1[%c5] : memref<98xf32, #tpu.memory_space<smem>>
    %542 = vector.broadcast %541 : f32 to vector<1x256xf32>
    %543 = arith.mulf %542, %81 : vector<1x256xf32>
    %c12 = arith.constant 12 : index
    %544 = memref.load %arg1[%c12] : memref<98xf32, #tpu.memory_space<smem>>
    %545 = vector.broadcast %544 : f32 to vector<1x256xf32>
    %546 = arith.mulf %545, %93 : vector<1x256xf32>
    %547 = arith.addf %543, %546 : vector<1x256xf32>
    %c19 = arith.constant 19 : index
    %548 = memref.load %arg1[%c19] : memref<98xf32, #tpu.memory_space<smem>>
    %549 = vector.broadcast %548 : f32 to vector<1x256xf32>
    %550 = arith.mulf %549, %105 : vector<1x256xf32>
    %551 = arith.addf %547, %550 : vector<1x256xf32>
    %c26 = arith.constant 26 : index
    %552 = memref.load %arg1[%c26] : memref<98xf32, #tpu.memory_space<smem>>
    %553 = vector.broadcast %552 : f32 to vector<1x256xf32>
    %554 = arith.mulf %553, %3 : vector<1x256xf32>
    %555 = arith.addf %551, %554 : vector<1x256xf32>
    %c33 = arith.constant 33 : index
    %556 = memref.load %arg1[%c33] : memref<98xf32, #tpu.memory_space<smem>>
    %557 = vector.broadcast %556 : f32 to vector<1x256xf32>
    %558 = arith.mulf %557, %117 : vector<1x256xf32>
    %559 = arith.addf %555, %558 : vector<1x256xf32>
    %c40 = arith.constant 40 : index
    %560 = memref.load %arg1[%c40] : memref<98xf32, #tpu.memory_space<smem>>
    %561 = vector.broadcast %560 : f32 to vector<1x256xf32>
    %562 = arith.mulf %561, %129 : vector<1x256xf32>
    %563 = arith.addf %559, %562 : vector<1x256xf32>
    %c47 = arith.constant 47 : index
    %564 = memref.load %arg1[%c47] : memref<98xf32, #tpu.memory_space<smem>>
    %565 = vector.broadcast %564 : f32 to vector<1x256xf32>
    %566 = arith.mulf %565, %141 : vector<1x256xf32>
    %567 = arith.addf %563, %566 : vector<1x256xf32>
    %c54 = arith.constant 54 : index
    %568 = memref.load %arg1[%c54] : memref<98xf32, #tpu.memory_space<smem>>
    %569 = vector.broadcast %568 : f32 to vector<1x256xf32>
    %570 = arith.mulf %569, %153 : vector<1x256xf32>
    %571 = arith.addf %567, %570 : vector<1x256xf32>
    %c61 = arith.constant 61 : index
    %572 = memref.load %arg1[%c61] : memref<98xf32, #tpu.memory_space<smem>>
    %573 = vector.broadcast %572 : f32 to vector<1x256xf32>
    %574 = arith.mulf %573, %165 : vector<1x256xf32>
    %575 = arith.addf %571, %574 : vector<1x256xf32>
    %c68 = arith.constant 68 : index
    %576 = memref.load %arg1[%c68] : memref<98xf32, #tpu.memory_space<smem>>
    %577 = vector.broadcast %576 : f32 to vector<1x256xf32>
    %578 = arith.mulf %577, %177 : vector<1x256xf32>
    %579 = arith.addf %575, %578 : vector<1x256xf32>
    %c75 = arith.constant 75 : index
    %580 = memref.load %arg1[%c75] : memref<98xf32, #tpu.memory_space<smem>>
    %581 = vector.broadcast %580 : f32 to vector<1x256xf32>
    %582 = arith.mulf %581, %4 : vector<1x256xf32>
    %583 = arith.addf %579, %582 : vector<1x256xf32>
    %c82 = arith.constant 82 : index
    %584 = memref.load %arg1[%c82] : memref<98xf32, #tpu.memory_space<smem>>
    %585 = vector.broadcast %584 : f32 to vector<1x256xf32>
    %586 = arith.mulf %585, %189 : vector<1x256xf32>
    %587 = arith.addf %583, %586 : vector<1x256xf32>
    %c89 = arith.constant 89 : index
    %588 = memref.load %arg1[%c89] : memref<98xf32, #tpu.memory_space<smem>>
    %589 = vector.broadcast %588 : f32 to vector<1x256xf32>
    %590 = arith.mulf %589, %201 : vector<1x256xf32>
    %591 = arith.addf %587, %590 : vector<1x256xf32>
    %c96 = arith.constant 96 : index
    %592 = memref.load %arg1[%c96] : memref<98xf32, #tpu.memory_space<smem>>
    %593 = vector.broadcast %592 : f32 to vector<1x256xf32>
    %594 = arith.mulf %593, %213 : vector<1x256xf32>
    %595 = arith.addf %591, %594 : vector<1x256xf32>
    %c254_i32 = arith.constant 254 : i32
    %596 = tpu.dynamic_rotate %595 by %c254_i32 dim 1 : vector<1x256xf32>, i32 -> vector<1x256xf32>
    %c2_i32_91 = arith.constant 2 : i32
    %597 = vector.broadcast %c2_i32_91 : i32 to vector<1x256xi32>
    %598 = arith.addi %69, %597 : vector<1x256xi32>
    %c0_i32_92 = arith.constant 0 : i32
    %599 = vector.broadcast %c0_i32_92 : i32 to vector<1x256xi32>
    %600 = arith.cmpi sge, %598, %599 : vector<1x256xi32>
    %c2_i32_93 = arith.constant 2 : i32
    %601 = vector.broadcast %c2_i32_93 : i32 to vector<1x256xi32>
    %602 = arith.addi %69, %601 : vector<1x256xi32>
    %c16_i32_94 = arith.constant 16 : i32
    %603 = vector.broadcast %c16_i32_94 : i32 to vector<1x256xi32>
    %604 = arith.cmpi slt, %602, %603 : vector<1x256xi32>
    %605 = arith.andi %600, %604 : vector<1x256xi1>
    %cst_95 = arith.constant 0.000000e+00 : f32
    %606 = vector.broadcast %cst_95 : f32 to vector<1x256xf32>
    %607 = arith.select %605, %596, %606 : vector<1x256xi1>, vector<1x256xf32>
    %608 = arith.addf %540, %607 : vector<1x256xf32>
    %c6 = arith.constant 6 : index
    %609 = memref.load %arg1[%c6] : memref<98xf32, #tpu.memory_space<smem>>
    %610 = vector.broadcast %609 : f32 to vector<1x256xf32>
    %611 = arith.mulf %610, %81 : vector<1x256xf32>
    %c13 = arith.constant 13 : index
    %612 = memref.load %arg1[%c13] : memref<98xf32, #tpu.memory_space<smem>>
    %613 = vector.broadcast %612 : f32 to vector<1x256xf32>
    %614 = arith.mulf %613, %93 : vector<1x256xf32>
    %615 = arith.addf %611, %614 : vector<1x256xf32>
    %c20 = arith.constant 20 : index
    %616 = memref.load %arg1[%c20] : memref<98xf32, #tpu.memory_space<smem>>
    %617 = vector.broadcast %616 : f32 to vector<1x256xf32>
    %618 = arith.mulf %617, %105 : vector<1x256xf32>
    %619 = arith.addf %615, %618 : vector<1x256xf32>
    %c27 = arith.constant 27 : index
    %620 = memref.load %arg1[%c27] : memref<98xf32, #tpu.memory_space<smem>>
    %621 = vector.broadcast %620 : f32 to vector<1x256xf32>
    %622 = arith.mulf %621, %3 : vector<1x256xf32>
    %623 = arith.addf %619, %622 : vector<1x256xf32>
    %c34 = arith.constant 34 : index
    %624 = memref.load %arg1[%c34] : memref<98xf32, #tpu.memory_space<smem>>
    %625 = vector.broadcast %624 : f32 to vector<1x256xf32>
    %626 = arith.mulf %625, %117 : vector<1x256xf32>
    %627 = arith.addf %623, %626 : vector<1x256xf32>
    %c41 = arith.constant 41 : index
    %628 = memref.load %arg1[%c41] : memref<98xf32, #tpu.memory_space<smem>>
    %629 = vector.broadcast %628 : f32 to vector<1x256xf32>
    %630 = arith.mulf %629, %129 : vector<1x256xf32>
    %631 = arith.addf %627, %630 : vector<1x256xf32>
    %c48 = arith.constant 48 : index
    %632 = memref.load %arg1[%c48] : memref<98xf32, #tpu.memory_space<smem>>
    %633 = vector.broadcast %632 : f32 to vector<1x256xf32>
    %634 = arith.mulf %633, %141 : vector<1x256xf32>
    %635 = arith.addf %631, %634 : vector<1x256xf32>
    %c55 = arith.constant 55 : index
    %636 = memref.load %arg1[%c55] : memref<98xf32, #tpu.memory_space<smem>>
    %637 = vector.broadcast %636 : f32 to vector<1x256xf32>
    %638 = arith.mulf %637, %153 : vector<1x256xf32>
    %639 = arith.addf %635, %638 : vector<1x256xf32>
    %c62 = arith.constant 62 : index
    %640 = memref.load %arg1[%c62] : memref<98xf32, #tpu.memory_space<smem>>
    %641 = vector.broadcast %640 : f32 to vector<1x256xf32>
    %642 = arith.mulf %641, %165 : vector<1x256xf32>
    %643 = arith.addf %639, %642 : vector<1x256xf32>
    %c69 = arith.constant 69 : index
    %644 = memref.load %arg1[%c69] : memref<98xf32, #tpu.memory_space<smem>>
    %645 = vector.broadcast %644 : f32 to vector<1x256xf32>
    %646 = arith.mulf %645, %177 : vector<1x256xf32>
    %647 = arith.addf %643, %646 : vector<1x256xf32>
    %c76 = arith.constant 76 : index
    %648 = memref.load %arg1[%c76] : memref<98xf32, #tpu.memory_space<smem>>
    %649 = vector.broadcast %648 : f32 to vector<1x256xf32>
    %650 = arith.mulf %649, %4 : vector<1x256xf32>
    %651 = arith.addf %647, %650 : vector<1x256xf32>
    %c83 = arith.constant 83 : index
    %652 = memref.load %arg1[%c83] : memref<98xf32, #tpu.memory_space<smem>>
    %653 = vector.broadcast %652 : f32 to vector<1x256xf32>
    %654 = arith.mulf %653, %189 : vector<1x256xf32>
    %655 = arith.addf %651, %654 : vector<1x256xf32>
    %c90 = arith.constant 90 : index
    %656 = memref.load %arg1[%c90] : memref<98xf32, #tpu.memory_space<smem>>
    %657 = vector.broadcast %656 : f32 to vector<1x256xf32>
    %658 = arith.mulf %657, %201 : vector<1x256xf32>
    %659 = arith.addf %655, %658 : vector<1x256xf32>
    %c97 = arith.constant 97 : index
    %660 = memref.load %arg1[%c97] : memref<98xf32, #tpu.memory_space<smem>>
    %661 = vector.broadcast %660 : f32 to vector<1x256xf32>
    %662 = arith.mulf %661, %213 : vector<1x256xf32>
    %663 = arith.addf %659, %662 : vector<1x256xf32>
    %c253_i32 = arith.constant 253 : i32
    %664 = tpu.dynamic_rotate %663 by %c253_i32 dim 1 : vector<1x256xf32>, i32 -> vector<1x256xf32>
    %c3_i32_96 = arith.constant 3 : i32
    %665 = vector.broadcast %c3_i32_96 : i32 to vector<1x256xi32>
    %666 = arith.addi %69, %665 : vector<1x256xi32>
    %c0_i32_97 = arith.constant 0 : i32
    %667 = vector.broadcast %c0_i32_97 : i32 to vector<1x256xi32>
    %668 = arith.cmpi sge, %666, %667 : vector<1x256xi32>
    %c3_i32_98 = arith.constant 3 : i32
    %669 = vector.broadcast %c3_i32_98 : i32 to vector<1x256xi32>
    %670 = arith.addi %69, %669 : vector<1x256xi32>
    %c16_i32_99 = arith.constant 16 : i32
    %671 = vector.broadcast %c16_i32_99 : i32 to vector<1x256xi32>
    %672 = arith.cmpi slt, %670, %671 : vector<1x256xi32>
    %673 = arith.andi %668, %672 : vector<1x256xi1>
    %cst_100 = arith.constant 0.000000e+00 : f32
    %674 = vector.broadcast %cst_100 : f32 to vector<1x256xf32>
    %675 = arith.select %673, %664, %674 : vector<1x256xi1>, vector<1x256xf32>
    %676 = arith.addf %608, %675 : vector<1x256xf32>
    %677 = arith.negf %676 : vector<1x256xf32>
    %678 = math.exp %677 : vector<1x256xf32>
    %cst_101 = arith.constant 1.000000e+00 : f32
    %679 = vector.broadcast %cst_101 : f32 to vector<1x256xf32>
    %680 = arith.addf %679, %678 : vector<1x256xf32>
    %681 = arith.divf %679, %680 : vector<1x256xf32>
    %682 = vector.shape_cast %681 : vector<1x256xf32> to vector<1x1x256xf32>
    %c0_102 = arith.constant 0 : index
    %c0_103 = arith.constant 0 : index
    %c0_104 = arith.constant 0 : index
    %683 = vector.load %arg2[%c0_102, %c0_103, %c0_104] : memref<1x4x256xf32, #tpu.memory_space<vmem>>, vector<1x4x256xf32>
    %684 = vector.broadcast %682 : vector<1x1x256xf32> to vector<1x4x256xf32>
    %685 = arith.mulf %683, %684 : vector<1x4x256xf32>
    %c0_105 = arith.constant 0 : index
    %c0_106 = arith.constant 0 : index
    %c0_107 = arith.constant 0 : index
    %686 = vector.load %arg3[%c0_105, %c0_106, %c0_107] : memref<1x4x256xf32, #tpu.memory_space<vmem>>, vector<1x4x256xf32>
    tpu.vector_store %arg3[%c0_105, %c0_106, %c0_107], %685 {strides = array<i32>} : memref<1x4x256xf32, #tpu.memory_space<vmem>>, vector<1x4x256xf32>,
    %687 = vector.shape_cast %681 : vector<1x256xf32> to vector<1x1x256xf32>
    %c0_108 = arith.constant 0 : index
    %c0_109 = arith.constant 0 : index
    %c0_110 = arith.constant 0 : index
    %688 = vector.load %arg4[%c0_108, %c0_109, %c0_110] : memref<1x1x256xf32, #tpu.memory_space<vmem>>, vector<1x1x256xf32>
    tpu.vector_store %arg4[%c0_108, %c0_109, %c0_110], %687 {strides = array<i32>} : memref<1x1x256xf32, #tpu.memory_space<vmem>>, vector<1x1x256xf32>,
    return
  }
  func.func @transform_0(%arg0: i32) -> i32 {
    %c0_i32 = arith.constant 0 : i32
    %c0_i32_0 = arith.constant 0 : i32
    return %c0_i32 : i32
  }
  func.func @transform_1(%arg0: i32) -> (i32, i32, i32) {
    %c0_i32 = arith.constant 0 : i32
    %c0_i32_0 = arith.constant 0 : i32
    %c0_i32_1 = arith.constant 0 : i32
    return %arg0, %c0_i32, %c0_i32_0 : i32, i32, i32
  }
  func.func @transform_2(%arg0: i32) -> (i32, i32, i32) {
    %c0_i32 = arith.constant 0 : i32
    %c0_i32_0 = arith.constant 0 : i32
    %c0_i32_1 = arith.constant 0 : i32
    return %arg0, %c0_i32, %c0_i32_0 : i32, i32, i32
  }
  func.func @transform_3(%arg0: i32) -> (i32, i32, i32) {
    %c0_i32 = arith.constant 0 : i32
    %c0_i32_0 = arith.constant 0 : i32
    %c0_i32_1 = arith.constant 0 : i32
    return %arg0, %c0_i32, %c0_i32_0 : i32, i32, i32
  }
}

</mosaic_0001>

<bundles_post_ra>
// kernel: tpu_custom_call.1
= control target key start
LH: loop header
LB: loop body
LE: loop exit
PB: predicated region body
PF: predicated region fallthrough
CT: control target
= control target key end

     0   :  { %s3031_s0 = inlined_call_operand.hbm [shape: f32[98], index: 0, kind: input, shape index: {}]   ;;  %s3032_s1 = inlined_call_operand.hbm [shape: f32[2,4,256], index: 1, kind: input, shape index: {}]   ;;  %s3033_s2 = inlined_call_operand.hbm [shape: f32[2,4,256], index: 2, kind: output, shape index: {0}]   ;;  %s3034_s3 = inlined_call_operand.hbm [shape: f32[2,1,256], index: 3, kind: output, shape index: {1}]  }
   0x1   :  { %3075 = sst [smem:[#allocation37_spill]] %s3031_s0 }
   0x2   :  { %3076 = sst [smem:[#allocation38_spill]] %s3032_s1 }
   0x3   :  { %3077 = sst [smem:[#allocation39_spill]] %s3033_s2 }
   0x4   :  { %3078 = sst [smem:[#allocation40_spill]] %s3034_s3 }
   0x5   :  { %9 = vsyncpa [#allocation5], 0 }
   0x6   :  { %10 = vsyncpa [#allocation3], 0 }
   0x7   :  { %12 = vsyncpa [#allocation3 + $0x1], 0 }
   0x8   :  { %13 = vsyncpa [#allocation4], 0 }
   0x9   :  { %15 = vsyncpa [#allocation4 + $0x1], 0 }
   0xa   :  { %16 = vsyncpa [#allocation9], 0 }
   0xb   :  { %18 = vsyncpa [#allocation9 + $0x1], 0  ;;  %s1796_s12 = smov 0   ;;  %s1798_s13 = smov 0  }
   0xc   :  { %s1800_s14 = smov 0   ;;  %s1802_s15 = smov 0  }
   0xd LB: > { %3079 = sst [smem:[#allocation14_spill]] %s1747_s12  ;;  %s1817_s16 = sadd.s32 4294967295, %s1759_s15   ;;  %s1759_s15 = sphi %s1802_s15, %s3210_s15   ;;  %s1755_s14 = sphi %s1800_s14, %s3213_s14   ;;  %s1751_s13 = sphi %s1798_s13, %s3212_s13   ;;  %s1747_s12 = sphi %s1796_s12, %s3211_s12  }
   0xe   : > { %3080 = sst [smem:[#allocation15_spill]] %s1751_s13  ;;  %s1406_s17 = sadd.s32 4294967294, %s1759_s15  }
   0xf   : > { %3081 = sst [smem:[#allocation16_spill]] %s1755_s14  ;;  %p65_p0 = scmp.ne.s32.totalorder %s1751_s13, %s1747_s12 }
  0x10   : > { %3082 = sst [smem:[#allocation17_spill]] %s1759_s15  ;;  %p66_p1 = scmp.eq.s32.totalorder %s1817_s16, 0 }
  0x11   : > { %3083 = sst [smem:[#allocation18_spill]] %s1817_s16  ;;  %p89_p2 = scmp.eq.s32.totalorder %s1817_s16, 1 }
  0x12   : > { %p95_p3 = scmp.eq.s32.totalorder %s1406_s17, 1  ;;  %p1826_p4 = por %p66_p1, %p65_p0 }
  0x13   : > { %p1407_p5 = scmp.ge.s32.totalorder %s1759_s15, 1  ;;  %p128_p7 = scmp.lt.s32.totalorder %s1759_s15, 3 }
  0x14   : > { %p1831_p6 = por %p95_p3, %p65_p0  ;;  %s3087_s0 = sld [smem:[#allocation37_spill]] }
  0x15   : > { %p1839_p8 = pnand %p1407_p5, %p128_p7  ;;  %s1847_s24 = sadd.s32 1, %s1759_s15  }
  0x16   : > { %s3085_s19 = scalar_select %p1831_p6, 1, 0 }
  0x17   : > { %p1536_p10 = pneg %p1839_p8  ;;  %3089 = sst [smem:[#allocation20_spill]] %s1847_s24 }
  0x18   : > { %3086 = sst [smem:[#allocation19_spill]] %s3085_s19  ;;  %s49_s25 = ssub.s32 %s1759_s15, %s1847_s24 }
  0x19   : > { %p1537_p11 = pnand %p1536_p10, %p66_p1  ;;  %p50_p12 = scmp.eq.s32.totalorder %s49_s25, 0 }
  0x1a   : > { %s140_s22 = sshll.u32 %s3087_s0, 4  ;;  %s52_s26 = sadd.s32 1, %s1755_s14  ;;  %s141_s22 = int_to_ptr.hbm [resolvable:$true] %s140_s22 }
  0x1b   : > { %p59_p13 = scmp.ne.s32.totalorder %s1755_s14, %s1751_s13  ;;  %s1761_s27 = smov [#allocation2]  }
  0x1c   : > { %1539 = dma.hbm_to_smem (!%p1537_p11), %s141_s22, 16, %s1761_s27, [#allocation5]  }
  0x1d   : > { %s1857_s28 = scalar_select %p50_p12, %s1755_s14, %s52_s26  }
  0x1e   : > { %p60_p0 = scmp.eq.s32.totalorder %s1759_s15, 0  ;;  %p1862_p3 = por %p89_p2, %p59_p13 }
  0x1f   : > { %3090 = sst [smem:[#allocation21_spill]] %s1857_s28  ;;  %s151_s30 = sand.u32 1, %s1755_s14  }
  0x20   : > { %s3091_s29 = scalar_select %p1862_p3, 1, 0 }
  0x21   : > { %p61_p5 = por %p60_p0, %p59_p13  ;;  %p1552_p7 = scmp.lt.s32.totalorder %s1759_s15, 2 }
  0x22   : > { %3092 = sst [smem:[#allocation22_spill]] %s3091_s29  ;;  %s1410_s4 = sshll.u32 %s151_s30, 3 }
  0x23   : > { %s1524_s5 = sshll.u32 %s1759_s15, 3  ;;  %s3093_s1 = sld [smem:[#allocation38_spill]] }
  0x24   : > { %s155_s10 = scalar_lea.vmem [#allocation6], %s1410_s4  ;;  %p1872_p10 = pnand %p1552_p7, %p61_p5 }
  0x25   : > { %s164_s11 = sshll.u32 %s155_s10, 4  ;;  %s152_s20 = scalar_lea.sflag [#allocation3], %s151_s30  ;;  %s165_s11 = int_to_ptr.vmem [resolvable:$true] %s164_s11 }
  0x26   : > { %p1631_p11 = pneg %p1872_p10 }
  0x29   : > { %s160_s8 = scalar_lea.hbm %s3093_s1, %s1524_s5  ;;  %s1634_s27 = scalar_lea.hbm %s3093_s1, 16 }
  0x2a   : > { %s162_s9 = sshll.u32 %s160_s8, 4  ;;  %s163_s9 = int_to_ptr.hbm [resolvable:$true] %s162_s9 }
  0x2b   : > { %s1627_s21 = sshra.s32 %s163_s9, 4  ;;  %s1628_s21 = int_to_ptr.hbm [resolvable:$true] %s1627_s21 }
  0x2c   : > { %s1629_s22 = scalar_lea.hbm %s1628_s21, 8  ;;  %p1635_p0 = scmp.lt.s32.totalorder %s1628_s21, %s3093_s1 }
  0x2d   : > { %p1630_p2 = scmp.ne.s32.totalorder %s1628_s21, %s1629_s22  ;;  %p1636_p5 = scmp.lt.s32.totalorder %s1634_s27, %s1629_s22 }
  0x2f   : > { %p1632_p12 = pnand %p1631_p11, %p1630_p2  ;;  %p1637_p7 = por %p1636_p5, %p1635_p0 }
  0x31   : > { %p1633_p13 = pneg %p1632_p12 }
  0x33   : > { %p1638_p9 = pnand %p1637_p7, %p1633_p13 }
  0x35   : > { %1641 = shalt.err (!%p1638_p9)
}
  0x36   : > { %1543 = dma.hbm_to_vmem [thread:$0]  (!%p1872_p10), %s163_s9, 128, %s165_s11, %s152_s20  }
  0x37   : > { %173 = sbr.rel (%p1839_p8) target bundleno = 507 (0x1fb), region = 28 }
  0x3c   : > { %1730 = dma.done.wait (%p66_p1), [#allocation5], 16  }
  0x3d   : > { %1732 = vsyncadd (%p66_p1), [#allocation5], 4294967280  ;;  %s1893_s30 = sand.u32 1, %s1751_s13  }
  0x3e   : > { %3095 = sst [smem:[#allocation23_spill]] %s1893_s30  ;;  %s3035_s6 = sshll.u32 %s1893_s30, 3 }
  0x3f   : > { %s181_s7 = scalar_lea.sflag [#allocation3], %s1893_s30  ;;  %s184_s8 = scalar_lea.vmem [#allocation6], %s3035_s6 }
  0x40   : > { %1734 = dma.done.wait (%p1826_p4), %s181_s7, 128  }
  0x41   : > { %1736 = vsyncadd (%p1826_p4), %s181_s7, 4294967168 }
  0x42   : > { %190 = sfence }
  0x43   : > { %v1903_v0 = vld [vmem:[%s184_s8] sm:$0xff]  ;;  %v1762_v1 = vmov 4.0   ;;  %vm3074_vm0 = vcmask 1043456   ;;  %s1763_s18 = smov 32   ;;  %s1764_s23 = smov 48   ;;  %v3055_v43 = vlaneseq }
  0x44   : > { %3096 = vst [vmem:[#allocation24_spill] sm:$0xff] %v1903_v0  ;;  %1602 = vrcp.f32 %v1762_v1  ;;  %s1765_s9 = smov 16   ;;  %s1766_s10 = smov 112  }
  0x45   : > { %216 = vst [vmem:[#allocation1] ss:$2 sm:$0xff] %v1903_v0  ;;  %s1767_s11 = smov 96   ;;  %s1768_s17 = smov 80   ;;  %v2002_v44 = vand.u32 127, %v3055_v43 }
  0x46   : > { %s1955_s20 = sld [smem:[#allocation2 + $0xe]] }
  0x47   : > { %s1957_s21 = sld [smem:[#allocation2 + $0xf]]  ;;  %3101 = vst [vmem:[#allocation29_spill] sm:$0xff] %v2002_v44  ;;  %v2013_v45 = vadd.s32 4294967280, %v2002_v44  ;;  %vm397_vm2 = vcmp.lt.s32.totalorder %v2002_v44, 16  ;;  %v2035_v55 = vadd.s32 4294967264, %v2002_v44  ;;  %vm380_vm4 = vcmp.lt.s32.totalorder %v2002_v44, 32 }
  0x48   : > { %s1959_s22 = sld [smem:[#allocation2 + $0x10]]  ;;  %vm363_vm5 = vcmp.lt.s32.totalorder %v2002_v44, 48  ;;  %vm414_vm8 = vcmp.lt.s32.totalorder %v2002_v44, 112  ;;  %vm431_vm10 = vcmp.lt.s32.totalorder %v2002_v44, 96  ;;  %vm448_vm12 = vcmp.lt.s32.totalorder %v2002_v44, 80 }
  0x49   : > { %s1961_s25 = sld [smem:[#allocation2 + $0x11]]  ;;  %3102 = vst [vmem:[#allocation30_spill] sm:$0xff] %v2013_v45  ;;  %vm402_vm3 = vcmp.ge.s32.totalorder %v2013_v45, 0  ;;  %vm385_vm6 = vcmp.ge.s32.totalorder %v2035_v55, 0 }
  0x4a   : > { %v1603_v2 = vpop.eup %1602  ;;  %s1963_s26 = sld [smem:[#allocation2 + $0x12]]  ;;  %3103 = vst [vmem:[#allocation31_spill] sm:$0xff] %v2035_v55 }
  0x4b   : > { %v237_v4 = vmul.f32 4.0, %v1603_v2  ;;  %vm241_vm1 = vweird.f32 %v1603_v2  ;;  %s1965_s27 = sld [smem:[#allocation2 + $0x13]] }
  0x4c   : > { %v217_v3 = vld.sshfl [vmem:[#allocation1] sm:$0xff pattern:$0x75316420]  ;;  %v218_v6 = vld.sshfl [vmem:[#allocation1 + $0x8] sm:$0xff pattern:$0x75316420]  ;;  %v520_v47 = vstv %s1955_s20 }
  0x4d   : > { %v222_v5 = vsel %vm3074_vm0, %v217_v3, 0.0  ;;  %v238_v8 = vsub.f32 1.0, %v237_v4  ;;  %v229_v9 = vsel %vm3074_vm0, %v218_v6, 0.0  ;;  %245 = vst [vmem:[#allocation1] ss:$2 sm:$0xff] %v1903_v0  ;;  %s1967_s4 = sld [smem:[#allocation2 + $0x14]]  ;;  %v619_v48 = vstv %s1957_s21 }
  0x4e   : > { %v223_v7 = vrot.slane %v222_v5, 4  ;;  %v230_v10 = vrot.slane %v229_v9, 4  ;;  %s1969_s5 = sld [smem:[#allocation2 + $0x7]]  ;;  %v720_v49 = vstv %s1959_s22 }
  0x4f   : > { %v239_v12 = vmul.f32 %v1603_v2, %v238_v8  ;;  %s1971_s7 = sld [smem:[#allocation2 + $0x8]]  ;;  %v821_v50 = vstv %s1961_s25 }
  0x50   : > { %v224_v11 = vadd.f32 %v223_v7, %v222_v5  ;;  %v231_v13 = vadd.f32 %v230_v10, %v229_v9  ;;  %s1973_s8 = sld [smem:[#allocation2 + $0x9]]  ;;  %v905_v51 = vstv %s1963_s26 }
  0x51   : > { %v240_v15 = vadd.f32 %v1603_v2, %v239_v12  ;;  %s1987_s6 = sld [smem:[#allocation2 + $0x2]]  ;;  %v1006_v52 = vstv %s1965_s27 }
  0x52   : > { %v225_v14 = vrot.slane %v224_v11, 2  ;;  %v232_v16 = vrot.slane %v231_v13, 2  ;;  %s1989_s0 = sld [smem:[#allocation2 + $0x3]] }
  0x53   : > { %v242_v20 = vsel %vm241_vm1, %v1603_v2, %v240_v15  ;;  %s1991_s1 = sld [smem:[#allocation2 + $0x4]]  ;;  %v1107_v53 = vstv %s1967_s4  ;;  %v2055_v2 = vadd.s32 4294967248, %v2002_v44 }
  0x54   : > { %v226_v17 = vadd.f32 %v225_v14, %v224_v11  ;;  %v233_v18 = vadd.f32 %v232_v16, %v231_v13  ;;  %v247_v25 = vld.sshfl [vmem:[#allocation1 + $0x8] sm:$0xff pattern:$0x75316420]  ;;  %v246_v26 = vld.sshfl [vmem:[#allocation1] sm:$0xff pattern:$0x75316420]  ;;  %v514_v56 = vstv %s1969_s5 }
  0x55   : > { %v257_v28 = vsel %vm3074_vm0, %v247_v25, -inf  ;;  %v250_v29 = vsel %vm3074_vm0, %v246_v26, -inf  ;;  %s1993_s28 = sld [smem:[#allocation2 + $0x5]]  ;;  %v613_v57 = vstv %s1971_s7  ;;  %3104 = vst [vmem:[#allocation32_spill] sm:$0xff] %v2055_v2  ;;  %vm368_vm7 = vcmp.ge.s32.totalorder %v2055_v2, 0 }
  0x56   : > { %v227_v19 = vrot.slane %v226_v17, 1  ;;  %v234_v22 = vrot.slane %v233_v18, 1  ;;  %v258_v30 = vrot.slane %v257_v28, 4  ;;  %v251_v31 = vrot.slane %v250_v29, 4  ;;  %s1995_s14 = sld [smem:[#allocation2 + $0x6]] }
  0x57   : > { %s1997_s13 = sld [smem:[#allocation2 + $0x15]]  ;;  %v714_v58 = vstv %s1973_s8 }
  0x58   : > { %v228_v21 = vadd.f32 %v227_v19, %v226_v17  ;;  %v235_v24 = vadd.f32 %v234_v22, %v233_v18  ;;  %v259_v32 = vmax.f32 %v257_v28, %v258_v30  ;;  %v252_v33 = vmax.f32 %v250_v29, %v251_v31  ;;  %s1999_s24 = sld [smem:[#allocation2 + $0x16]] }
  0x59   : > { %s2004_s15 = sld [smem:[#allocation2 + $0x1c]]  ;;  %v3111_v45 = vstv %s1989_s0 }
  0x5a   : > { %v1909_v23 = vmul.f32 %v242_v20, %v228_v21  ;;  %v1917_v27 = vmul.f32 %v242_v20, %v235_v24  ;;  %v260_v34 = vrot.slane %v259_v32, 2  ;;  %v253_v35 = vrot.slane %v252_v33, 2  ;;  %s2006_s19 = sld [smem:[#allocation2 + $0x1d]] }
  0x5b   : > { %3099 = sst [smem:[#allocation27_spill]] %s1993_s28  ;;  %v2094_v20 = vadd.s32 128, %v2002_v44 }
  0x5c   : > { %376 = vrot.lane.b32.xlu1 %v1909_v23, %s1763_s18  ;;  %359 = vrot.lane.b32.xlu0 %v1909_v23, %s1764_s23  ;;  %v261_v36 = vmax.f32 %v259_v32, %v260_v34  ;;  %v254_v37 = vmax.f32 %v252_v33, %v253_v35  ;;  %3100 = sst [smem:[#allocation28_spill]] %s1995_s14 }
  0x5d   : > { %393 = vrot.lane.b32.xlu2 %v1909_v23, %s1765_s9  ;;  %s2008_s12 = sld [smem:[#allocation2 + $0x17]]  ;;  %v526_v16 = vstv %s1997_s13  ;;  %3105 = vst [vmem:[#allocation33_spill] sm:$0xff] %v2094_v20 }
  0x5e   : > { %v262_v38 = vrot.slane %v261_v36, 1  ;;  %v255_v39 = vrot.slane %v254_v37, 1  ;;  %s2010_s29 = sld [smem:[#allocation2 + $0x1e]]  ;;  %v625_v25 = vstv %s1999_s24  ;;  %v2113_v31 = vmul.f32 %v526_v16, %v1917_v27 }
  0x5f   : > { %s2015_s2 = sld [smem:[#allocation2 + $0x18]]  ;;  %v2157_v43 = vmul.f32 %v625_v25, %v1909_v23 }
  0x60   : > { %v1933_v40 = vmax.f32 %v261_v36, %v262_v38  ;;  %v1935_v41 = vmax.f32 %v254_v37, %v255_v39  ;;  %s2018_s3 = sld [smem:[#allocation2 + $0x1f]]  ;;  %v2126_v37 = vadd.s32 16, %v2094_v20  ;;  %v2129_v38 = vmul.f32 %v625_v25, %v1917_v27 }
  0x61   : > { %s2022_s30 = sld [smem:[#allocation2 + $0x19]]  ;;  %v2175_v25 = vadd.s32 32, %v2094_v20 }
  0x62   : > { %3097 = vst [vmem:[#allocation25_spill] sm:$0xff] %v1933_v40  ;;  %s2028_s16 = sld [smem:[#allocation2 + $0x20]]  ;;  %vm422_vm9 = vcmp.lt.s32.totalorder %v2126_v37, 256 }
  0x63   : > { %3098 = vst [vmem:[#allocation26_spill] sm:$0xff] %v1935_v41  ;;  %s2037_s20 = sld [smem:[#allocation2 + $0x1a]]  ;;  %v726_v32 = vstv %s2008_s12  ;;  %vm439_vm11 = vcmp.lt.s32.totalorder %v2175_v25, 256 }
  0x64   : > { %378 = vrot.lane.b32.xlu1 %v1917_v27, %s1763_s18  ;;  %361 = vrot.lane.b32.xlu0 %v1917_v27, %s1764_s23  ;;  %s2043_s21 = sld [smem:[#allocation2 + $0x21]] }
  0x65   : > { %395 = vrot.lane.b32.xlu2 %v1917_v27, %s1765_s9  ;;  %s2050_s22 = sld [smem:[#allocation2 + $0x1b]]  ;;  %v827_v34 = vstv %s2015_s2 }
  0x66   : > { %s2059_s25 = sld [smem:[#allocation2 + $0x22]] }
  0x67   : > { %s2065_s26 = sld [smem:[#allocation2 + $0x23]]  ;;  %v911_v35 = vstv %s2022_s30 }
  0x68   : > { %s2074_s27 = sld [smem:[#allocation2 + $0x24]] }
  0x69   : > { %s2083_s4 = sld [smem:[#allocation2 + $0x25]]  ;;  %v1012_v36 = vstv %s2037_s20 }
  0x6a   : > { %s2096_s14 = sld [smem:[#allocation2 + $0x26]] }
  0x6b   : > { %s2106_s13 = sld [smem:[#allocation2 + $0x27]] }
  0x6c   : > { %412 = vrot.lane.b32.xlu1 %v1917_v27, %s1766_s10  ;;  %410 = vrot.lane.b32.xlu0 %v1909_v23, %s1766_s10  ;;  %s2116_s28 = sld [smem:[#allocation2 + $0x28]] }
  0x6d   : > { %427 = vrot.lane.b32.xlu2 %v1909_v23, %s1767_s11  ;;  %s2122_s24 = sld [smem:[#allocation2 + $0x29]] }
  0x6e   : > { %s3113_s2 = sld [smem:[#allocation27_spill]] }
  0x6f   : > { %s3114_s12 = sld [smem:[#allocation28_spill]] }
  0x70   : > { %s2312_s0 = sld [smem:[#allocation2 + $0x2a]] }
  0x71   : > { %s2367_s30 = sld [smem:[#allocation2 + $0x31]] }
  0x72   : > { %s2396_s5 = sld [smem:[#allocation2 + $0x35]] }
  0x73   : > { %s2401_s7 = sld [smem:[#allocation2 + $0x36]] }
  0x74   : > { %444 = vrot.lane.b32.xlu1 %v1909_v23, %s1768_s17  ;;  %429 = vrot.lane.b32.xlu0 %v1917_v27, %s1767_s11  ;;  %s2415_s8 = sld [smem:[#allocation2 + $0x37]] }
  0x75   : > { %446 = vrot.lane.b32.xlu2 %v1917_v27, %s1768_s17  ;;  %s2455_s20 = sld [smem:[#allocation2 + $0x3e]] }
  0x7c   : > { %463 = vrot.lane.b32.xlu1 %v1933_v40, %s1764_s23  ;;  %461 = vrot.lane.b32.xlu0 %v1935_v41, %s1764_s23  ;;  %s1977_s23 = sld [smem:[#allocation2 + $0xb]] }
  0x7d   : > { %469 = vrot.lane.b32.xlu2 %v1935_v41, %s1763_s18 }
  0x82   : > { %v899_v61 = vstv %s1977_s23  ;;  %s2423_s23 = sld [smem:[#allocation2 + $0x39]] }
  0x84   : > { %477 = vrot.lane.b32.xlu1 %v1935_v41, %s1765_s9  ;;  %471 = vrot.lane.b32.xlu0 %v1933_v40, %s1763_s18  ;;  %s1975_s18 = sld [smem:[#allocation2 + $0xa]] }
  0x85   : > { %479 = vrot.lane.b32.xlu2 %v1933_v40, %s1765_s9  ;;  %s1979_s9 = sld [smem:[#allocation2 + $0xc]] }
  0x8a   : > { %v815_v59 = vstv %s1975_s18  ;;  %s2419_s18 = sld [smem:[#allocation2 + $0x38]] }
  0x8b   : > { %v1000_v62 = vstv %s1979_s9  ;;  %s2432_s9 = sld [smem:[#allocation2 + $0x3a]] }
  0x8c   : > { %487 = vrot.lane.b32.xlu1 %v1933_v40, %s1766_s10  ;;  %485 = vrot.lane.b32.xlu0 %v1935_v41, %s1766_s10  ;;  %s1981_s10 = sld [smem:[#allocation2 + $0xd]] }
  0x8d   : > { %493 = vrot.lane.b32.xlu2 %v1935_v41, %s1767_s11 }
  0x92   : > { %v3062_v63 = vstv %s1981_s10 }
  0x94   : > { %495 = vrot.lane.b32.xlu0 %v1933_v40, %s1767_s11  ;;  %501 = vrot.lane.b32.xlu1 %v1935_v41, %s1768_s17  ;;  %s1983_s11 = sld [smem:[#allocation2]] }
  0x95   : > { %503 = vrot.lane.b32.xlu2 %v1933_v40, %s1768_s17  ;;  %s1985_s17 = sld [smem:[#allocation2 + $0x1]] }
  0x9a   : > { %v510_v3 = vstv %s1983_s11  ;;  %s2442_s11 = sld [smem:[#allocation2 + $0x3c]] }
  0x9b   : > { %v609_v4 = vstv %s1985_s17  ;;  %s2446_s17 = sld [smem:[#allocation2 + $0x3d]] }
  0xb7   : > { %v394_v42 = vpop.permute.xlu2 %393 }
  0xbf   : > { %v396_v46 = vpop.permute.xlu2 %395 }
  0xc0   : > { %v399_v54 = vsel %vm397_vm2, %v396_v46, %v394_v42  ;;  %v398_v60 = vsel %vm397_vm2, %v394_v42, %v396_v46  ;;  %v1113_v42 = vstv %s2050_s22  ;;  %v2134_v46 = vmul.f32 %v726_v32, %v1917_v27  ;;  %s2493_s22 = sld [smem:[#allocation2 + $0x41]] }
  0xc1   : > { %v408_v1 = vsel %vm402_vm3, %v399_v54, 0.0  ;;  %v2067_v9 = vmul.f32 %v520_v47, %v398_v60  ;;  %v2069_v10 = vmul.f32 %v619_v48, %v398_v60  ;;  %v2071_v11 = vmul.f32 %v720_v49, %v398_v60 }
  0xc2   : > { %v2076_v13 = vmul.f32 %v520_v47, %v408_v1  ;;  %v2078_v14 = vmul.f32 %v619_v48, %v408_v1  ;;  %v2080_v15 = vmul.f32 %v720_v49, %v408_v1  ;;  %v2085_v17 = vmul.f32 %v821_v50, %v408_v1 }
  0xc3   : > { %v2087_v18 = vmul.f32 %v821_v50, %v398_v60  ;;  %v2089_v19 = vmul.f32 %v905_v51, %v408_v1  ;;  %v2098_v21 = vmul.f32 %v905_v51, %v398_v60  ;;  %v2100_v22 = vmul.f32 %v1006_v52, %v408_v1 }
  0xc4   : > { %v2102_v24 = vmul.f32 %v1006_v52, %v398_v60  ;;  %v2108_v29 = vmul.f32 %v1107_v53, %v408_v1  ;;  %v2110_v30 = vmul.f32 %v1107_v53, %v398_v60  ;;  %v2140_v50 = vmul.f32 %v827_v34, %v1917_v27 }
  0xc5   : > { %v2143_v51 = vmul.f32 %v911_v35, %v1917_v27  ;;  %v2146_v52 = vmul.f32 %v1012_v36, %v1917_v27  ;;  %v2150_v54 = vmul.f32 %v1113_v42, %v1917_v27  ;;  %v2154_v1 = vmul.f32 %v526_v16, %v1909_v23 }
  0xc6   : > { %v2160_v49 = vmul.f32 %v726_v32, %v1909_v23  ;;  %v2163_v48 = vmul.f32 %v827_v34, %v1909_v23  ;;  %v2166_v53 = vmul.f32 %v911_v35, %v1909_v23  ;;  %v2169_v27 = vmul.f32 %v1012_v36, %v1909_v23 }
  0xc7   : > { %v2172_v16 = vmul.f32 %v1113_v42, %v1909_v23 }
  0xc8   : > { %3106 = vst [vmem:[#allocation34_spill] sm:$0xff] %v2166_v53 }
  0xc9   : > { %3107 = vst [vmem:[#allocation35_spill] sm:$0xff] %v2169_v27 }
  0xca   : > { %3108 = vst [vmem:[#allocation36_spill] sm:$0xff] %v2172_v16 }
  0xce   : > { %v377_v26 = vpop.permute.xlu1 %376  ;;  %v360_v28 = vpop.permute.xlu0 %359 }
  0xd6   : > { %v379_v34 = vpop.permute.xlu1 %378  ;;  %v362_v47 = vpop.permute.xlu0 %361 }
  0xd7   : > { %v381_v42 = vsel %vm380_vm4, %v377_v26, %v379_v34  ;;  %v382_v60 = vsel %vm380_vm4, %v379_v34, %v377_v26  ;;  %v364_v32 = vsel %vm363_vm5, %v360_v28, %v362_v47  ;;  %v365_v33 = vsel %vm363_vm5, %v362_v47, %v360_v28 }
  0xd8   : > { %v391_v36 = vsel %vm385_vm6, %v382_v60, 0.0  ;;  %v516_v23 = vmul.f32 %v514_v56, %v381_v42  ;;  %v615_v39 = vmul.f32 %v613_v57, %v381_v42  ;;  %v716_v60 = vmul.f32 %v714_v58, %v381_v42 }
  0xd9   : > { %v515_v26 = vmul.f32 %v514_v56, %v391_v36  ;;  %v614_v34 = vmul.f32 %v613_v57, %v391_v36  ;;  %v715_v35 = vmul.f32 %v714_v58, %v391_v36  ;;  %v816_v12 = vmul.f32 %v815_v59, %v391_v36 }
  0xda   : > { %v817_v8 = vmul.f32 %v815_v59, %v381_v42  ;;  %v900_v7 = vmul.f32 %v899_v61, %v391_v36  ;;  %v901_v28 = vmul.f32 %v899_v61, %v381_v42  ;;  %v1001_v56 = vmul.f32 %v1000_v62, %v391_v36 }
  0xdb   : > { %v1002_v57 = vmul.f32 %v1000_v62, %v381_v42  ;;  %v1102_v47 = vmul.f32 %v3062_v63, %v391_v36  ;;  %v374_v6 = vsel %vm368_vm7, %v365_v33, 0.0  ;;  %v512_v5 = vmul.f32 %v510_v3, %v364_v32 }
  0xdc   : > { %v511_v58 = vmul.f32 %v510_v3, %v374_v6  ;;  %v610_v0 = vmul.f32 %v609_v4, %v374_v6  ;;  %v611_v59 = vmul.f32 %v609_v4, %v364_v32  ;;  %v3109_v61 = vstv %s1987_s6  ;;  %s2388_s6 = sld [smem:[#allocation2 + $0x33]] }
  0xdd   : > { %v711_v41 = vmul.f32 %v3109_v61, %v374_v6  ;;  %v3110_v40 = vmov %v3109_v61  ;;  %v812_v36 = vmul.f32 %v3111_v45, %v374_v6  ;;  %v3112_v63 = vmov %v3111_v45 }
  0xde   : > { %v712_v62 = vmul.f32 %v3110_v40, %v364_v32  ;;  %v813_v55 = vmul.f32 %v3112_v63, %v364_v32  ;;  %v517_v33 = vadd.f32 %v515_v26, %v511_v58  ;;  %v518_v2 = vadd.f32 %v516_v23, %v512_v5  ;;  %v411_v16 = vpop.permute.xlu0 %410  ;;  %v2240_v40 = vpop.permute.xlu2 %427 }
  0xdf   : > { %v616_v3 = vadd.f32 %v614_v34, %v610_v0  ;;  %v617_v20 = vadd.f32 %v615_v39, %v611_v59  ;;  %v717_v4 = vadd.f32 %v715_v35, %v711_v41  ;;  %v818_v61 = vadd.f32 %v816_v12, %v812_v36 }
  0xe0   : > { %v718_v27 = vadd.f32 %v716_v60, %v712_v62  ;;  %v819_v53 = vadd.f32 %v817_v8, %v813_v55  ;;  %v3115_v45 = vstv %s1981_s10  ;;  %v523_v26 = vadd.f32 %v2076_v13, %v517_v33  ;;  %v413_v8 = vpop.permute.xlu1 %412  ;;  %s2440_s10 = sld [smem:[#allocation2 + $0x3b]] }
  0xe1   : > { %v1103_v63 = vmul.f32 %v3115_v45, %v381_v42  ;;  %v524_v0 = vadd.f32 %v2067_v9, %v518_v2  ;;  %v622_v5 = vadd.f32 %v2078_v14, %v616_v3  ;;  %v623_v39 = vadd.f32 %v2069_v10, %v617_v20 }
  0xe2   : > { %v724_v41 = vadd.f32 %v2071_v11, %v718_v27  ;;  %v824_v35 = vadd.f32 %v2085_v17, %v818_v61  ;;  %v825_v55 = vadd.f32 %v2087_v18, %v819_v53  ;;  %v3116_v12 = vstv %s1991_s1  ;;  %s2319_s1 = sld [smem:[#allocation2 + $0x2b]] }
  0xe3   : > { %v896_v23 = vmul.f32 %v3116_v12, %v374_v6  ;;  %v3117_v34 = vmov %v3116_v12  ;;  %v3118_v42 = vstv %s3113_s2  ;;  %v723_v2 = vadd.f32 %v2080_v15, %v717_v4  ;;  %s2551_s2 = sld [smem:[#allocation2 + $0x5d]] }
  0xe4   : > { %v897_v60 = vmul.f32 %v3117_v34, %v364_v32  ;;  %v997_v58 = vmul.f32 %v3118_v42, %v374_v6  ;;  %v3119_v13 = vmov %v3118_v42  ;;  %v3120_v9 = vstv %s3114_s12  ;;  %s2559_s12 = sld [smem:[#allocation2 + $0x4e]] }
  0xe5   : > { %v998_v59 = vmul.f32 %v3119_v13, %v364_v32  ;;  %v1098_v14 = vmul.f32 %v3120_v9, %v374_v6  ;;  %v3121_v10 = vmov %v3120_v9  ;;  %v530_v11 = vadd.f32 %v2113_v31, %v524_v0  ;;  %v3130_v13 = vld [vmem:[#allocation34_spill] sm:$0xff] }
  0xe6   : > { %v1099_v20 = vmul.f32 %v3121_v10, %v364_v32  ;;  %v902_v17 = vadd.f32 %v900_v7, %v896_v23  ;;  %v903_v27 = vadd.f32 %v901_v28, %v897_v60  ;;  %v1003_v18 = vadd.f32 %v1001_v56, %v997_v58  ;;  %v2290_v4 = vpop.permute.xlu2 %446 }
  0xe7   : > { %v1004_v53 = vadd.f32 %v1002_v57, %v998_v59  ;;  %v1104_v62 = vadd.f32 %v1102_v47, %v1098_v14  ;;  %v629_v33 = vadd.f32 %v2129_v38, %v623_v39  ;;  %v730_v3 = vadd.f32 %v2134_v46, %v724_v41  ;;  %v3133_v14 = vld [vmem:[#allocation35_spill] sm:$0xff] }
  0xe8   : > { %v1105_v36 = vadd.f32 %v1103_v63, %v1099_v20  ;;  %v908_v61 = vadd.f32 %v2089_v19, %v902_v17  ;;  %v909_v15 = vadd.f32 %v2098_v21, %v903_v27  ;;  %v831_v31 = vadd.f32 %v2140_v50, %v825_v55  ;;  %v430_v21 = vpop.permute.xlu0 %429 }
  0xe9   : > { %v1010_v6 = vadd.f32 %v2102_v24, %v1004_v53  ;;  %v1009_v7 = vadd.f32 %v2100_v22, %v1003_v18  ;;  %v415_v46 = vsel %vm414_vm8, %v411_v16, %v413_v8  ;;  %v416_v19 = vsel %vm414_vm8, %v413_v8, %v411_v16 }
  0xea   : > { %v1111_v38 = vadd.f32 %v2110_v30, %v1105_v36  ;;  %v1110_v24 = vadd.f32 %v2108_v29, %v1104_v62  ;;  %v915_v50 = vadd.f32 %v2143_v51, %v909_v15  ;;  %v426_v22 = vsel %vm422_vm9, %v416_v19, 0.0  ;;  %v3136_v62 = vld [vmem:[#allocation36_spill] sm:$0xff] }
  0xeb   : > { %v529_v30 = vadd.f32 %v2154_v1, %v523_v26  ;;  %v1016_v32 = vadd.f32 %v2146_v52, %v1010_v6  ;;  %v3122_v28 = vstv %s2004_s15  ;;  %v628_v47 = vadd.f32 %v2157_v43, %v622_v5  ;;  %v2303_v5 = vpop.permute.xlu1 %444  ;;  %s2330_s15 = sld [smem:[#allocation2 + $0x2d]] }
  0xec   : > { %v533_v56 = vmul.f32 %v3122_v28, %v415_v46  ;;  %v3123_v57 = vmov %v3122_v28  ;;  %v3124_v29 = vstv %s2006_s19  ;;  %v729_v0 = vadd.f32 %v2160_v49, %v723_v2  ;;  %s2347_s19 = sld [smem:[#allocation2 + $0x2f]] }
  0xed   : > { %v534_v16 = vmul.f32 %v3123_v57, %v426_v22  ;;  %v632_v45 = vmul.f32 %v3124_v29, %v415_v46  ;;  %v3125_v51 = vmov %v3124_v29  ;;  %v3126_v1 = vstv %s2010_s29  ;;  %s2357_s29 = sld [smem:[#allocation2 + $0x30]] }
  0xee   : > { %v633_v63 = vmul.f32 %v3125_v51, %v426_v22  ;;  %v733_v26 = vmul.f32 %v3126_v1, %v415_v46  ;;  %v1117_v52 = vadd.f32 %v2150_v54, %v1111_v38  ;;  %v535_v39 = vadd.f32 %v533_v56, %v529_v30 }
  0xef   : > { %v3127_v41 = vmov %v3126_v1  ;;  %v830_v43 = vadd.f32 %v2163_v48, %v824_v35  ;;  %v536_v8 = vadd.f32 %v534_v16, %v530_v11  ;;  %v634_v12 = vadd.f32 %v632_v45, %v628_v47  ;;  %v2359_v45 = vpop.permute.xlu2 %469 }
  0xf0   : > { %v734_v55 = vmul.f32 %v3127_v41, %v426_v22  ;;  %v635_v23 = vadd.f32 %v633_v63, %v629_v33  ;;  %v3128_v34 = vstv %s2018_s3  ;;  %v735_v49 = vadd.f32 %v733_v26, %v729_v0  ;;  %s2324_s3 = sld [smem:[#allocation2 + $0x2c]] }
  0xf1   : > { %v834_v60 = vmul.f32 %v3128_v34, %v415_v46  ;;  %v3129_v42 = vmov %v3128_v34  ;;  %v914_v54 = vadd.f32 %v3130_v13, %v908_v61  ;;  %v3131_v59 = vstv %s2028_s16  ;;  %s2338_s16 = sld [smem:[#allocation2 + $0x2e]] }
  0xf2   : > { %v835_v58 = vmul.f32 %v3129_v42, %v426_v22  ;;  %v918_v2 = vmul.f32 %v3131_v59, %v415_v46  ;;  %v3132_v35 = vmov %v3131_v59  ;;  %v1015_v10 = vadd.f32 %v3133_v14, %v1009_v7 }
  0xf3   : > { %v836_v48 = vadd.f32 %v834_v60, %v830_v43  ;;  %v919_v9 = vmul.f32 %v3132_v35, %v426_v22  ;;  %v3134_v20 = vstv %s2043_s21  ;;  %v736_v17 = vadd.f32 %v734_v55, %v730_v3  ;;  %s2464_s21 = sld [smem:[#allocation2 + $0x42]] }
  0xf4   : > { %v1019_v11 = vmul.f32 %v3134_v20, %v415_v46  ;;  %v837_v27 = vadd.f32 %v835_v58, %v831_v31  ;;  %v3135_v18 = vmov %v3134_v20  ;;  %v1116_v36 = vadd.f32 %v3136_v62, %v1110_v24  ;;  %v2369_v58 = vpop.permute.xlu1 %463 }
  0xf5   : > { %v1020_v53 = vmul.f32 %v3135_v18, %v426_v22  ;;  %v920_v33 = vadd.f32 %v918_v2, %v914_v54  ;;  %v921_v61 = vadd.f32 %v919_v9, %v915_v50  ;;  %v3137_v15 = vstv %s2059_s25  ;;  %s2501_s25 = sld [smem:[#allocation2 + $0x48]] }
  0xf6   : > { %v1120_v6 = vmul.f32 %v3137_v15, %v415_v46  ;;  %v3138_v7 = vmov %v3137_v15  ;;  %v1021_v3 = vadd.f32 %v1019_v11, %v1015_v10  ;;  %v432_v19 = vsel %vm431_vm10, %v2240_v40, %v430_v21  ;;  %v2340_v46 = vpop.permute.xlu0 %461 }
  0xf7   : > { %v1121_v38 = vmul.f32 %v3138_v7, %v426_v22  ;;  %v1022_v31 = vadd.f32 %v1020_v53, %v1016_v32  ;;  %v433_v24 = vsel %vm431_vm10, %v430_v21, %v2240_v40  ;;  %v3139_v30 = vstv %s2065_s26  ;;  %s2509_s26 = sld [smem:[#allocation2 + $0x40]] }
  0xf8   : > { %v1122_v50 = vadd.f32 %v1120_v6, %v1116_v36  ;;  %v443_v22 = vsel %vm439_vm11, %v433_v24, 0.0  ;;  %v539_v32 = vmul.f32 %v3139_v30, %v432_v19  ;;  %v3140_v28 = vmov %v3139_v30 }
  0xf9   : > { %v540_v56 = vmul.f32 %v3140_v28, %v443_v22  ;;  %v3141_v57 = vstv %s2074_s27  ;;  %v3143_v47 = vstv %s2083_s4  ;;  %v1123_v51 = vadd.f32 %v1121_v38, %v1117_v52  ;;  %s2515_s27 = sld [smem:[#allocation2 + $0x4f]] }
  0xfa   : > { %v638_v40 = vmul.f32 %v3141_v57, %v432_v19  ;;  %v3142_v21 = vmov %v3141_v57  ;;  %v739_v29 = vmul.f32 %v3143_v47, %v432_v19  ;;  %v3144_v63 = vmov %v3143_v47  ;;  %v2421_v57 = vpop.permute.xlu2 %479  ;;  %s2521_s4 = sld [smem:[#allocation2 + $0x47]] }
  0xfb   : > { %v639_v16 = vmul.f32 %v3142_v21, %v443_v22  ;;  %v740_v0 = vmul.f32 %v3144_v63, %v443_v22  ;;  %v3145_v1 = vstv %s2096_s14  ;;  %v541_v43 = vadd.f32 %v539_v32, %v535_v39  ;;  %s2381_s14 = sld [smem:[#allocation2 + $0x32]] }
  0xfc   : > { %v840_v26 = vmul.f32 %v3145_v1, %v432_v19  ;;  %v3146_v41 = vmov %v3145_v1  ;;  %v542_v34 = vadd.f32 %v540_v56, %v536_v8  ;;  %v640_v60 = vadd.f32 %v638_v40, %v634_v12  ;;  %v2430_v63 = vpop.permute.xlu1 %477 }
  0xfd   : > { %v841_v55 = vmul.f32 %v3146_v41, %v443_v22  ;;  %v641_v42 = vadd.f32 %v639_v16, %v635_v23  ;;  %v741_v13 = vadd.f32 %v739_v29, %v735_v49  ;;  %v3147_v59 = vstv %s2106_s13  ;;  %s2533_s13 = sld [smem:[#allocation2 + $0x56]] }
  0xfe   : > { %v842_v54 = vadd.f32 %v840_v26, %v836_v48  ;;  %v924_v2 = vmul.f32 %v3147_v59, %v432_v19  ;;  %v3148_v35 = vmov %v3147_v59  ;;  %v3149_v14 = vstv %s2116_s28  ;;  %s2391_s28 = sld [smem:[#allocation2 + $0x34]] }
  0xff   : > { %v843_v52 = vadd.f32 %v841_v55, %v837_v27  ;;  %v925_v9 = vmul.f32 %v3148_v35, %v443_v22  ;;  %v1025_v10 = vmul.f32 %v3149_v14, %v432_v19  ;;  %v3150_v20 = vmov %v3149_v14  ;;  %v3153_v27 = vld [vmem:[#allocation33_spill] sm:$0xff] }
 0x100   : > { %v1026_v11 = vmul.f32 %v3150_v20, %v443_v22  ;;  %v3151_v39 = vstv %s2122_s24  ;;  %v742_v12 = vadd.f32 %v740_v0, %v736_v17  ;;  %v926_v23 = vadd.f32 %v924_v2, %v920_v33  ;;  %s2545_s24 = sld [smem:[#allocation2 + $0x3f]] }
 0x101   : > { %v1126_v8 = vmul.f32 %v3151_v39, %v432_v19  ;;  %v3152_v49 = vmov %v3151_v39  ;;  %v2386_v18 = vadd.s32 48, %v3153_v27  ;;  %v927_v53 = vadd.f32 %v925_v9, %v921_v61  ;;  %v2403_v61 = vpop.permute.xlu0 %471 }
 0x102   : > { %v1127_v48 = vmul.f32 %v3152_v49, %v443_v22  ;;  %v1027_v62 = vadd.f32 %v1025_v10, %v1021_v3  ;;  %v1028_v36 = vadd.f32 %v1026_v11, %v1022_v31  ;;  %v544_v15 = vstv %s2312_s0  ;;  %s2569_s0 = sld [smem:[#allocation2 + $0x46]] }
 0x103   : > { %v1128_v17 = vadd.f32 %v1126_v8, %v1122_v50  ;;  %vm456_vm13 = vcmp.lt.s32.totalorder %v2386_v18, 256  ;;  %v643_v33 = vstv %s2319_s1  ;;  %v744_v6 = vstv %s2324_s3  ;;  %s2582_s1 = sld [smem:[#allocation2 + $0x55]] }
 0x104   : > { %v1129_v7 = vadd.f32 %v1127_v48, %v1123_v51  ;;  %v845_v38 = vstv %s2330_s15  ;;  %v929_v19 = vstv %s2338_s16  ;;  %v1030_v24 = vstv %s2347_s19  ;;  %s2599_s3 = sld [smem:[#allocation2 + $0x5c]] }
 0x105   : > { %v1131_v3 = vstv %s2357_s29  ;;  %v449_v31 = vsel %vm448_vm12, %v2303_v5, %v2290_v4  ;;  %v450_v50 = vsel %vm448_vm12, %v2290_v4, %v2303_v5  ;;  %v550_v22 = vstv %s2367_s30  ;;  %s2617_s15 = sld [smem:[#allocation2 + $0x4d]] }
 0x106   : > { %v460_v30 = vsel %vm456_vm13, %v450_v50, 0.0  ;;  %v545_v32 = vmul.f32 %v544_v15, %v449_v31  ;;  %v644_v28 = vmul.f32 %v643_v33, %v449_v31  ;;  %v745_v56 = vmul.f32 %v744_v6, %v449_v31  ;;  %s2625_s16 = sld [smem:[#allocation2 + $0x43]] }
 0x107   : > { %v546_v40 = vmul.f32 %v544_v15, %v460_v30  ;;  %v645_v21 = vmul.f32 %v643_v33, %v460_v30  ;;  %v746_v16 = vmul.f32 %v744_v6, %v460_v30  ;;  %v846_v47 = vmul.f32 %v845_v38, %v449_v31  ;;  %s2639_s19 = sld [smem:[#allocation2 + $0x54]] }
 0x108   : > { %v2425_v4 = vadd.f32 %v545_v32, %v541_v43  ;;  %v2427_v5 = vadd.f32 %v644_v28, %v640_v60  ;;  %v847_v29 = vmul.f32 %v845_v38, %v460_v30  ;;  %v649_v51 = vstv %s2381_s14  ;;  %v2491_v38 = vpop.permute.xlu2 %493  ;;  %s2646_s29 = sld [smem:[#allocation2 + $0x5b]] }
 0x109   : > { %v2434_v0 = vadd.f32 %v546_v40, %v542_v34  ;;  %v2436_v1 = vadd.f32 %v645_v21, %v641_v42  ;;  %v2438_v26 = vadd.f32 %v745_v56, %v741_v13  ;;  %v848_v41 = vadd.f32 %v846_v47, %v842_v54  ;;  %v2476_v49 = vpop.permute.xlu0 %485  ;;  %s2657_s30 = sld [smem:[#allocation2 + $0x4a]] }
 0x10a   : > { %v849_v55 = vadd.f32 %v847_v29, %v843_v52  ;;  %v930_v43 = vmul.f32 %v929_v19, %v449_v31  ;;  %v931_v60 = vmul.f32 %v929_v19, %v460_v30  ;;  %v1031_v59 = vmul.f32 %v1030_v24, %v449_v31  ;;  %s2662_s14 = sld [smem:[#allocation2 + $0x51]] }
 0x10b   : > { %v2444_v2 = vadd.f32 %v746_v16, %v742_v12  ;;  %v1032_v34 = vmul.f32 %v1030_v24, %v460_v30  ;;  %v1132_v42 = vmul.f32 %v1131_v3, %v449_v31  ;;  %v1133_v35 = vmul.f32 %v1131_v3, %v460_v30  ;;  %v488_v30 = vpop.permute.xlu1 %487 }
 0x10c   : > { %v2448_v13 = vadd.f32 %v930_v43, %v926_v23  ;;  %v2450_v54 = vadd.f32 %v931_v60, %v927_v53  ;;  %v2452_v52 = vadd.f32 %v1031_v59, %v1027_v62  ;;  %v750_v9 = vstv %s2388_s6  ;;  %s2669_s6 = sld [smem:[#allocation2 + $0x58]] }
 0x10d   : > { %v2457_v14 = vadd.f32 %v1032_v34, %v1028_v36  ;;  %v2459_v10 = vadd.f32 %v1132_v42, %v1128_v17  ;;  %v2461_v20 = vadd.f32 %v1133_v35, %v1129_v7  ;;  %v851_v11 = vstv %s2391_s28  ;;  %s2675_s28 = sld [smem:[#allocation2 + $0x5f]] }
 0x10e   : > { %v935_v39 = vstv %s2396_s5  ;;  %v1036_v8 = vstv %s2401_s7  ;;  %v465_v12 = vsel %vm363_vm5, %v2340_v46, %v2369_v58  ;;  %v466_v23 = vsel %vm363_vm5, %v2369_v58, %v2340_v46  ;;  %s1769_s5 = smov 1   ;;  %s2705_s7 = sld [smem:[#allocation2 + $0x44]] }
 0x10f   : > { %v1137_v48 = vstv %s2415_s8  ;;  %v467_v62 = vsel %vm368_vm7, %v466_v23, 0.0  ;;  %v2481_v36 = vmul.f32 %v550_v22, %v465_v12  ;;  %v2483_v15 = vmul.f32 %v649_v51, %v465_v12  ;;  %s2713_s8 = sld [smem:[#allocation2 + $0x4b]] }
 0x110   : > { %v2485_v17 = vmul.f32 %v550_v22, %v467_v62  ;;  %v2487_v33 = vmul.f32 %v649_v51, %v467_v62  ;;  %v2489_v6 = vmul.f32 %v750_v9, %v465_v12  ;;  %v852_v7 = vmul.f32 %v851_v11, %v467_v62 }
 0x111   : > { %v2495_v46 = vmul.f32 %v750_v9, %v467_v62  ;;  %v853_v58 = vmul.f32 %v851_v11, %v465_v12  ;;  %v2497_v19 = vmul.f32 %v935_v39, %v467_v62  ;;  %v2499_v24 = vmul.f32 %v935_v39, %v465_v12 }
 0x112   : > { %v854_v3 = vadd.f32 %v852_v7, %v848_v41  ;;  %v2503_v31 = vmul.f32 %v1036_v8, %v467_v62  ;;  %v2505_v50 = vmul.f32 %v1036_v8, %v465_v12  ;;  %v2507_v22 = vmul.f32 %v1137_v48, %v467_v62 }
 0x113   : > { %v855_v32 = vadd.f32 %v853_v58, %v849_v55  ;;  %v2511_v28 = vmul.f32 %v1137_v48, %v465_v12  ;;  %v556_v56 = vstv %s2419_s18  ;;  %v655_v40 = vstv %s2423_s23  ;;  %v496_v48 = vpop.permute.xlu0 %495  ;;  %s2721_s18 = sld [smem:[#allocation2 + $0x52]]  ;;  %s1770_s23 = smov 2  }
 0x114   : > { %3155 = vst [vmem:[#allocation34_spill] sm:$0xff] %v2505_v50  ;;  %v756_v21 = vstv %s2432_s9  ;;  %v857_v16 = vstv %s2440_s10  ;;  %v941_v47 = vstv %s2442_s11  ;;  %v1042_v29 = vstv %s2446_s17  ;;  %s2727_s9 = sld [smem:[#allocation2 + $0x59]]  ;;  %s1771_s11 = smov 3  }
 0x115   : > { %v1143_v51 = vstv %s2455_s20  ;;  %v473_v41 = vsel %vm380_vm4, %v2359_v45, %v2403_v61  ;;  %v474_v55 = vsel %vm380_vm4, %v2403_v61, %v2359_v45  ;;  %v863_v43 = vstv %s2464_s21  ;;  %s2736_s10 = sld [smem:[#allocation2 + $0x60]] }
 0x116   : > { %v475_v59 = vsel %vm385_vm6, %v474_v55, 0.0  ;;  %v2537_v34 = vmul.f32 %v556_v56, %v473_v41  ;;  %v657_v42 = vmul.f32 %v655_v40, %v473_v41  ;;  %v2543_v35 = vsel %vm397_vm2, %v2430_v63, %v2421_v57  ;;  %s2754_s17 = sld [smem:[#allocation2 + $0x45]] }
 0x117   : > { %v2547_v9 = vmul.f32 %v556_v56, %v475_v59  ;;  %v2549_v45 = vmul.f32 %v655_v40, %v475_v59  ;;  %v758_v61 = vmul.f32 %v756_v21, %v473_v41  ;;  %v858_v11 = vmul.f32 %v857_v16, %v475_v59  ;;  %s2762_s20 = sld [smem:[#allocation2 + $0x4c]] }
 0x118   : > { %v2553_v39 = vmul.f32 %v756_v21, %v475_v59  ;;  %v859_v8 = vmul.f32 %v857_v16, %v473_v41  ;;  %v2555_v12 = vmul.f32 %v941_v47, %v475_v59  ;;  %v2557_v23 = vmul.f32 %v941_v47, %v473_v41  ;;  %v504_v16 = vpop.permute.xlu2 %503  ;;  %v502_v47 = vpop.permute.xlu1 %501  ;;  %s2767_s21 = sld [smem:[#allocation2 + $0x53]] }
 0x119   : > { %v2561_v53 = vadd.f32 %v858_v11, %v854_v3  ;;  %v2563_v62 = vmul.f32 %v1042_v29, %v475_v59  ;;  %v2565_v7 = vmul.f32 %v1042_v29, %v473_v41  ;;  %v2567_v58 = vmul.f32 %v1143_v51, %v475_v59 }
 0x11a   : > { %v2571_v56 = vadd.f32 %v859_v8, %v855_v32  ;;  %v2573_v40 = vmul.f32 %v1143_v51, %v473_v41  ;;  %v482_v21 = vsel %vm397_vm2, %v2421_v57, %v2430_v63  ;;  %v2580_v3 = vmul.f32 %v863_v43, %v2543_v35 }
 0x11b   : > { %3157 = vst [vmem:[#allocation35_spill] sm:$0xff] %v2561_v53  ;;  %v2586_v32 = vsel %vm402_vm3, %v482_v21, 0.0  ;;  %v2591_v51 = vsel %vm414_vm8, %v2476_v49, %v488_v30  ;;  %v490_v57 = vsel %vm414_vm8, %v488_v30, %v2476_v49  ;;  %v498_v63 = vsel %vm431_vm10, %v496_v48, %v2491_v38 }
 0x11c   : > { %3158 = vst [vmem:[#allocation36_spill] sm:$0xff] %v2565_v7  ;;  %v2602_v41 = vmul.f32 %v863_v43, %v2586_v32  ;;  %v2606_v55 = vsel %vm422_vm9, %v490_v57, 0.0  ;;  %v2611_v49 = vsel %vm431_vm10, %v2491_v38, %v496_v48  ;;  %v2615_v30 = vsel %vm439_vm11, %v498_v63, 0.0 }
 0x11d   : > { %3159 = vst [vmem:[#allocation32_spill] sm:$0xff] %v2571_v56  ;;  %v506_v37 = vsel %vm448_vm12, %v504_v16, %v502_v47  ;;  %v754_v43 = vadd.f32 %v2489_v6, %v2444_v2  ;;  %v3070_v60 = vstv %s2493_s22  ;;  %v3069_v59 = vstv %s2501_s25  ;;  %v3163_v6 = vld [vmem:[#allocation25_spill] sm:$0xff] }
 0x11e   : > { %3160 = vst [vmem:[#allocation31_spill] sm:$0xff] %v2580_v3  ;;  %v2629_v25 = vsel %vm448_vm12, %v502_v47, %v504_v16  ;;  %v2633_v38 = vsel %vm456_vm13, %v506_v37, 0.0  ;;  %v764_v11 = vmul.f32 %v3070_v60, %v2543_v35  ;;  %v3067_v8 = vstv %s2515_s27 }
 0x11f   : > { %3162 = vst [vmem:[#allocation30_spill] sm:$0xff] %v2602_v41  ;;  %v760_v2 = vadd.f32 %v758_v61, %v754_v43  ;;  %v770_v48 = vmul.f32 %v3069_v59, %v3163_v6  ;;  %v3068_v21 = vstv %s2533_s13  ;;  %v3071_v16 = vstv %s2551_s2 }
 0x120   : > { %v776_v18 = vmul.f32 %v3067_v8, %v2606_v55  ;;  %v782_v47 = vmul.f32 %v3068_v21, %v2615_v30  ;;  %v653_v29 = vadd.f32 %v2483_v15, %v2436_v1  ;;  %v661_v57 = vstv %s2509_s26  ;;  %s1772_s26 = smov 127  }
 0x121   : > { %v766_v61 = vadd.f32 %v764_v11, %v760_v2  ;;  %v663_v63 = vmul.f32 %v661_v57, %v2543_v35  ;;  %v667_v37 = vstv %s2521_s4  ;;  %v673_v43 = vstv %s2559_s12  ;;  %s2826_s4 = sld [smem:[#allocation2 + $0x50]]  ;;  %s1774_s12 = smov 125  }
 0x122   : > { %v788_v8 = vmul.f32 %v3071_v16, %v2633_v38  ;;  %v659_v21 = vadd.f32 %v657_v42, %v653_v29  ;;  %v669_v59 = vmul.f32 %v667_v37, %v3163_v6  ;;  %v679_v60 = vstv %s2582_s1  ;;  %s3198_s1 = sld [smem:[#allocation23_spill]] }
 0x123   : > { %v772_v1 = vadd.f32 %v770_v48, %v766_v61  ;;  %v675_v15 = vmul.f32 %v673_v43, %v2606_v55  ;;  %v685_v11 = vstv %s2599_s3  ;;  %v554_v2 = vadd.f32 %v2481_v36, %v2434_v0 }
 0x124   : > { %v665_v27 = vadd.f32 %v663_v63, %v659_v21  ;;  %v681_v42 = vmul.f32 %v679_v60, %v2615_v30  ;;  %v562_v29 = vstv %s2545_s24  ;;  %v568_v16 = vstv %s2569_s0  ;;  %s1773_s24 = smov 126   ;;  %s3197_s0 = sld [smem:[#allocation18_spill]] }
 0x125   : > { %v778_v44 = vadd.f32 %v776_v18, %v772_v1  ;;  %v560_v3 = vadd.f32 %v2537_v34, %v554_v2  ;;  %v564_v48 = vmul.f32 %v562_v29, %v2543_v35  ;;  %v570_v61 = vmul.f32 %v568_v16, %v3163_v6 }
 0x126   : > { %v671_v56 = vadd.f32 %v669_v59, %v665_v27  ;;  %v687_v0 = vmul.f32 %v685_v11, %v2633_v38  ;;  %v574_v36 = vstv %s2617_s15  ;;  %v580_v21 = vstv %s2639_s19 }
 0x127   : > { %v784_v63 = vadd.f32 %v782_v47, %v778_v44  ;;  %v566_v41 = vadd.f32 %v564_v48, %v560_v3  ;;  %v576_v53 = vmul.f32 %v574_v36, %v2606_v55  ;;  %v586_v18 = vstv %s2646_s29  ;;  %s3199_s29 = sld [smem:[#allocation40_spill]] }
 0x128   : > { %v677_v1 = vadd.f32 %v675_v15, %v671_v56  ;;  %v582_v34 = vmul.f32 %v580_v21, %v2615_v30  ;;  %v939_v2 = vadd.f32 %v2499_v24, %v2450_v54  ;;  %v947_v27 = vstv %s2625_s16  ;;  %s1417_s15 = sshll.u32 %s3198_s1, 1 }
 0x129   : > { %v790_v59 = vadd.f32 %v788_v8, %v784_v63  ;;  %v572_v7 = vadd.f32 %v570_v61, %v566_v41  ;;  %v949_v50 = vmul.f32 %v947_v27, %v2543_v35  ;;  %v953_v44 = vstv %s2657_s30 }
 0x12a   : > { %v683_v3 = vadd.f32 %v681_v42, %v677_v1  ;;  %v945_v47 = vadd.f32 %v2557_v23, %v939_v2  ;;  %v955_v56 = vmul.f32 %v953_v44, %v3163_v6  ;;  %v959_v15 = vstv %s2662_s14  ;;  %s1521_s3 = sshll.u32 %s3197_s0, 1  ;;  %s1525_s14 = sshll.u32 %s3197_s0, 3 }
 0x12b   : > { %793 = vrot.lane.b32.xlu2 %v790_v59, %s1769_s5  ;;  %v578_v54 = vadd.f32 %v576_v53, %v572_v7  ;;  %v588_v24 = vmul.f32 %v586_v18, %v2633_v38  ;;  %v965_v41 = vstv %s2669_s6  ;;  %v971_v8 = vstv %s2675_s28  ;;  %s213_s6 = scalar_lea.vmem [#allocation8], %s1417_s15 }
 0x12c   : > { %v689_v48 = vadd.f32 %v687_v0, %v683_v3  ;;  %v951_v61 = vadd.f32 %v949_v50, %v945_v47  ;;  %v961_v23 = vmul.f32 %v959_v15, %v2606_v55  ;;  %v967_v42 = vmul.f32 %v965_v41, %v2615_v30  ;;  %v3164_v0 = vld [vmem:[#allocation26_spill] sm:$0xff]  ;;  %s1288_s28 = sshll.u32 %s213_s6, 4  ;;  %s1289_s28 = int_to_ptr.vmem [resolvable:$true] %s1288_s28 }
 0x12d   : > { %v584_v63 = vadd.f32 %v582_v34, %v578_v54  ;;  %v973_v53 = vmul.f32 %v971_v8, %v2633_v38  ;;  %v652_v7 = vadd.f32 %v2487_v33, %v2427_v5  ;;  %v662_v1 = vmul.f32 %v661_v57, %v2586_v32  ;;  %s1286_s30 = scalar_lea.hbm %s3199_s29, %s1521_s3 }
 0x12e   : > { %692 = vrot.lane.b32.xlu0 %v689_v48, %s1770_s23  ;;  %v957_v50 = vadd.f32 %v955_v56, %v951_v61  ;;  %v668_v2 = vmul.f32 %v667_v37, %v3164_v0  ;;  %v674_v59 = vmul.f32 %v673_v43, %v2591_v51  ;;  %v680_v34 = vmul.f32 %v679_v60, %v2611_v49 }
 0x12f   : > { %v590_v3 = vadd.f32 %v588_v24, %v584_v63  ;;  %v658_v47 = vadd.f32 %v2549_v45, %v652_v7  ;;  %v553_v5 = vadd.f32 %v2485_v17, %v2425_v4  ;;  %v563_v33 = vmul.f32 %v562_v29, %v2586_v32 }
 0x130   : > { %v963_v57 = vadd.f32 %v961_v23, %v957_v50  ;;  %v686_v56 = vmul.f32 %v685_v11, %v2629_v25  ;;  %v569_v37 = vmul.f32 %v568_v16, %v3164_v0  ;;  %v575_v60 = vmul.f32 %v574_v36, %v2591_v51 }
 0x131   : > { %593 = vrot.lane.b32.xlu1 %v590_v3, %s1771_s11  ;;  %v664_v45 = vadd.f32 %v662_v1, %v658_v47  ;;  %v559_v4 = vadd.f32 %v2547_v9, %v553_v5  ;;  %v581_v17 = vmul.f32 %v580_v21, %v2611_v49  ;;  %v753_v43 = vadd.f32 %v2495_v46, %v2438_v26 }
 0x132   : > { %v969_v11 = vadd.f32 %v967_v42, %v963_v57  ;;  %v587_v16 = vmul.f32 %v586_v18, %v2629_v25  ;;  %v3165_v29 = vstv %s2493_s22  ;;  %v3166_v54 = vstv %s2501_s25  ;;  %s2773_s22 = sld [smem:[#allocation2 + $0x5a]] }
 0x133   : > { %v763_v36 = vmul.f32 %v3165_v29, %v2586_v32  ;;  %v769_v24 = vmul.f32 %v3166_v54, %v3164_v0  ;;  %v670_v48 = vadd.f32 %v668_v2, %v664_v45  ;;  %v565_v61 = vadd.f32 %v563_v33, %v559_v4  ;;  %s2778_s25 = sld [smem:[#allocation2 + $0x61]] }
 0x134   : > { %v759_v9 = vadd.f32 %v2553_v39, %v753_v43  ;;  %v3167_v21 = vstv %s2515_s27  ;;  %v975_v46 = vadd.f32 %v973_v53, %v969_v11  ;;  %v3168_v18 = vstv %s2533_s13  ;;  %s2821_s27 = sld [smem:[#allocation2 + $0x49]] }
 0x135   : > { %v775_v26 = vmul.f32 %v3167_v21, %v2591_v51  ;;  %v781_v23 = vmul.f32 %v3168_v18, %v2611_v49  ;;  %v1039_v42 = vadd.f32 %v2503_v31, %v2452_v52  ;;  %v1048_v63 = vstv %s2705_s7  ;;  %s2835_s13 = sld [smem:[#allocation2 + $0x57]] }
 0x136   : > { %v676_v7 = vadd.f32 %v674_v59, %v670_v48  ;;  %v571_v39 = vadd.f32 %v569_v37, %v565_v61  ;;  %v765_v1 = vadd.f32 %v763_v36, %v759_v9  ;;  %v1049_v50 = vmul.f32 %v1048_v63, %v2586_v32 }
 0x137   : > { %v1045_v53 = vadd.f32 %v2563_v62, %v1039_v42  ;;  %v1054_v2 = vstv %s2713_s8  ;;  %v1060_v3 = vstv %s2721_s18  ;;  %v1066_v52 = vstv %s2727_s9  ;;  %s3200_s18 = sld [smem:[#allocation39_spill]] }
 0x138   : > { %v682_v31 = vadd.f32 %v680_v34, %v676_v7  ;;  %v577_v59 = vadd.f32 %v575_v60, %v571_v39  ;;  %v771_v47 = vadd.f32 %v769_v24, %v765_v1  ;;  %v1055_v5 = vmul.f32 %v1054_v2, %v3164_v0 }
 0x139   : > { %v3169_v33 = vstv %s2551_s2  ;;  %v1051_v62 = vadd.f32 %v1049_v50, %v1045_v53  ;;  %v1061_v37 = vmul.f32 %v1060_v3, %v2591_v51  ;;  %v1072_v45 = vstv %s2736_s10  ;;  %978 = vrot.lane.b32.xlu1 %v975_v46, %s1772_s26  ;;  %s2847_s2 = sld [smem:[#allocation2 + $0x5e]]  ;;  %s3203_s10 = sshll.u32 %s3198_s1, 3 }
 0x13a   : > { %v787_v57 = vmul.f32 %v3169_v33, %v2629_v25  ;;  %v688_v34 = vadd.f32 %v686_v56, %v682_v31  ;;  %v583_v60 = vadd.f32 %v581_v17, %v577_v59  ;;  %v777_v4 = vadd.f32 %v775_v26, %v771_v47 }
 0x13b   : > { %v1067_v43 = vmul.f32 %v1066_v52, %v2611_v49  ;;  %v1057_v11 = vadd.f32 %v1055_v5, %v1051_v62  ;;  %v1073_v29 = vmul.f32 %v1072_v45, %v2629_v25  ;;  %v938_v36 = vadd.f32 %v2497_v19, %v2448_v13 }
 0x13c   : > { %v948_v54 = vmul.f32 %v947_v27, %v2586_v32  ;;  %690 = vrot.lane.b32.xlu2 %v688_v34, %s1770_s23  ;;  %v589_v56 = vadd.f32 %v587_v16, %v583_v60  ;;  %v783_v17 = vadd.f32 %v781_v23, %v777_v4  ;;  %v954_v24 = vmul.f32 %v953_v44, %v3164_v0  ;;  %v3171_v60 = vld [vmem:[#allocation36_spill] sm:$0xff] }
 0x13d   : > { %v960_v48 = vmul.f32 %v959_v15, %v2591_v51  ;;  %v1063_v61 = vadd.f32 %v1061_v37, %v1057_v11  ;;  %v944_v9 = vadd.f32 %v2555_v12, %v938_v36  ;;  %v966_v13 = vmul.f32 %v965_v41, %v2611_v49  ;;  %v3172_v11 = vld [vmem:[#allocation35_spill] sm:$0xff]  ;;  %s2983_s23 = scalar_lea.hbm %s3200_s18, %s1525_s14 }
 0x13e   : > { %v1140_v19 = vadd.f32 %v2507_v22, %v2459_v10  ;;  %591 = vrot.lane.b32.xlu0 %v589_v56, %s1771_s11  ;;  %v972_v27 = vmul.f32 %v971_v8, %v2629_v25  ;;  %v1149_v44 = vstv %s2754_s17  ;;  %v1155_v16 = vstv %s2762_s20  ;;  %v3175_v56 = vld [vmem:[#allocation31_spill] sm:$0xff]  ;;  %s206_s11 = scalar_lea.vmem [#allocation7], %s3203_s10  ;;  %s1276_s20 = sshll.u32 %s2983_s23, 4  ;;  %s1277_s20 = int_to_ptr.hbm [resolvable:$true] %s1276_s20 }
 0x13f   : > { %v1161_v21 = vstv %s2767_s21  ;;  %v1069_v15 = vadd.f32 %v1067_v43, %v1063_v61  ;;  %v950_v26 = vadd.f32 %v948_v54, %v944_v9  ;;  %v1150_v12 = vmul.f32 %v1149_v44, %v2586_v32  ;;  %v3174_v54 = vld [vmem:[#allocation32_spill] sm:$0xff]  ;;  %s1274_s17 = sshll.u32 %s206_s11, 4  ;;  %s1261_s21 = scalar_lea.sflag [#allocation9], %s3198_s1  ;;  %s1275_s17 = int_to_ptr.vmem [resolvable:$true] %s1274_s17 }
 0x140   : > { %v1146_v46 = vadd.f32 %v2567_v58, %v1140_v19  ;;  %v789_v41 = vadd.f32 %v787_v57, %v783_v17  ;;  %v1156_v18 = vmul.f32 %v1155_v16, %v3164_v0  ;;  %v1167_v10 = vstv %s2773_s22 }
 0x141   : > { %v1173_v22 = vstv %s2778_s25  ;;  %v1075_v23 = vadd.f32 %v1073_v29, %v1069_v15  ;;  %v956_v8 = vadd.f32 %v954_v24, %v950_v26  ;;  %v1162_v7 = vmul.f32 %v1161_v21, %v2591_v51  ;;  %v3173_v29 = vld [vmem:[#allocation30_spill] sm:$0xff] }
 0x142   : > { %v1152_v42 = vadd.f32 %v1150_v12, %v1146_v46  ;;  %791 = vrot.lane.b32.xlu1 %v789_v41, %s1769_s5  ;;  %v1168_v58 = vmul.f32 %v1167_v10, %v2611_v49  ;;  %v1174_v32 = vmul.f32 %v1173_v22, %v2629_v25  ;;  %v1141_v39 = vadd.f32 %v2511_v28, %v2461_v20  ;;  %v3170_v28 = vld [vmem:[#allocation34_spill] sm:$0xff]  ;;  %s1290_s5 = sshll.u32 %s1286_s30, 4  ;;  %s1291_s5 = int_to_ptr.hbm [resolvable:$true] %s1290_s5 }
 0x143   : > { %v1151_v1 = vmul.f32 %v1149_v44, %v2543_v35  ;;  %v962_v50 = vadd.f32 %v960_v48, %v956_v8  ;;  %v1157_v31 = vmul.f32 %v1155_v16, %v3163_v6  ;;  %v1163_v59 = vmul.f32 %v1161_v21, %v2606_v55  ;;  %s1671_s22 = sshra.s32 %s1291_s5, 4  ;;  %s1672_s22 = int_to_ptr.hbm [resolvable:$true] %s1671_s22 }
 0x144   : > { %v1158_v53 = vadd.f32 %v1156_v18, %v1152_v42  ;;  %1077 = vrot.lane.b32.xlu2 %v1075_v23, %s1773_s24  ;;  %v1147_v47 = vadd.f32 %v2573_v40, %v1141_v39  ;;  %v1169_v20 = vmul.f32 %v1167_v10, %v2615_v30  ;;  %v1040_v5 = vadd.f32 %v3170_v28, %v2457_v14  ;;  %s1673_s25 = scalar_lea.hbm %s1672_s22, 2  ;;  %p1678_p9 = scmp.lt.s32.totalorder %s1672_s22, %s3199_s29 }
 0x145   : > { %v1050_v33 = vmul.f32 %v1048_v63, %v2543_v35  ;;  %v968_v57 = vadd.f32 %v966_v13, %v962_v50  ;;  %v1175_v37 = vmul.f32 %v1173_v22, %v2633_v38  ;;  %v1056_v34 = vmul.f32 %v1054_v2, %v3163_v6  ;;  %p1674_p1 = scmp.ne.s32.totalorder %s1672_s22, %s1673_s25 }
 0x146   : > { %v1164_v62 = vadd.f32 %v1162_v7, %v1158_v53  ;;  %v1153_v40 = vadd.f32 %v1151_v1, %v1147_v47  ;;  %v1046_v4 = vadd.f32 %v3171_v60, %v1040_v5  ;;  %v1062_v14 = vmul.f32 %v1060_v3, %v2606_v55 }
 0x147   : > { %v1068_v35 = vmul.f32 %v1066_v52, %v2615_v30  ;;  %v974_v63 = vadd.f32 %v972_v27, %v968_v57  ;;  %v866_v36 = vadd.f32 %v3173_v29, %v3172_v11  ;;  %v867_v17 = vadd.f32 %v3175_v56, %v3174_v54  ;;  %p1675_p4 = pnand %p1674_p1, %p1862_p3 }
 0x148   : > { %v1170_v43 = vadd.f32 %v1168_v58, %v1164_v62  ;;  %v1159_v24 = vadd.f32 %v1157_v31, %v1153_v40  ;;  %v1052_v2 = vadd.f32 %v1050_v33, %v1046_v4  ;;  %v869_v48 = vstv %s2821_s27  ;;  %v3177_v58 = vld [vmem:[#allocation33_spill] sm:$0xff] }
 0x149   : > { %v875_v61 = vstv %s2826_s4  ;;  %976 = vrot.lane.b32.xlu0 %v974_v63, %s1772_s26  ;;  %v870_v3 = vmul.f32 %v869_v48, %v3164_v0  ;;  %v871_v52 = vmul.f32 %v869_v48, %v3163_v6  ;;  %v881_v16 = vstv %s2835_s13  ;;  %p1676_p8 = pneg %p1675_p4  ;;  %s1677_s4 = scalar_lea.hbm %s3199_s29, 4 }
 0x14a   : > { %v1176_v9 = vadd.f32 %v1174_v32, %v1170_v43  ;;  %v876_v13 = vmul.f32 %v875_v61, %v2591_v51  ;;  %v1165_v19 = vadd.f32 %v1163_v59, %v1159_v24  ;;  %v1058_v27 = vadd.f32 %v1056_v34, %v1052_v2  ;;  %p1679_p10 = scmp.lt.s32.totalorder %s1677_s4, %s1673_s25 }
 0x14b   : > { %v877_v44 = vmul.f32 %v875_v61, %v2606_v55  ;;  %v872_v21 = vadd.f32 %v870_v3, %v866_v36  ;;  %v873_v15 = vadd.f32 %v871_v52, %v867_v17  ;;  %v882_v26 = vmul.f32 %v881_v16, %v2611_v49 }
 0x14c   : > { %1178 = vrot.lane.b32.xlu1 %v1176_v9, %s1774_s12  ;;  %v883_v46 = vmul.f32 %v881_v16, %v2615_v30  ;;  %v1171_v12 = vadd.f32 %v1169_v20, %v1165_v19  ;;  %v1064_v0 = vadd.f32 %v1062_v14, %v1058_v27  ;;  %v1074_v6 = vmul.f32 %v1072_v45, %v2633_v38  ;;  %v3176_v45 = vld [vmem:[#allocation29_spill] sm:$0xff]  ;;  %p1680_p2 = por %p1679_p10, %p1678_p9 }
 0x14d   : > { %v887_v41 = vstv %s2847_s2  ;;  %v878_v51 = vadd.f32 %v876_v13, %v872_v21  ;;  %v879_v18 = vadd.f32 %v877_v44, %v873_v15  ;;  %vm267_vm14 = vcmp.ge.s32.totalorder %v3176_v45, 16 }
 0x14e   : > { %v888_v10 = vmul.f32 %v887_v41, %v2629_v25  ;;  %v889_v55 = vmul.f32 %v887_v41, %v2633_v38  ;;  %v1177_v22 = vadd.f32 %v1175_v37, %v1171_v12  ;;  %v1070_v23 = vadd.f32 %v1068_v35, %v1064_v0  ;;  %p1681_p11 = pnand %p1680_p2, %p1676_p8 }
 0x14f   : > { %v884_v8 = vadd.f32 %v882_v26, %v878_v51  ;;  %v885_v42 = vadd.f32 %v883_v46, %v879_v18  ;;  %vm271_vm15 = vcmp.ge.s32.totalorder %v3176_v45, 32  ;;  %vm314_vm1 = vcmp.ge.s32.totalorder %v3177_v58, 144 }
 0x150   : > { %1180 = vrot.lane.b32.xlu2 %v1177_v22, %s1774_s12  ;;  %v1076_v49 = vadd.f32 %v1074_v6, %v1070_v23  ;;  %v1775_v25 = vmov 0   ;;  %vm277_vm2 = vcmp.ge.s32.totalorder %v3176_v45, 48  ;;  %vm320_vm3 = vcmp.ge.s32.totalorder %v3177_v58, 160 }
 0x151   : > { %v2880_v7 = vadd.f32 %v888_v10, %v884_v8  ;;  %v2882_v30 = vadd.f32 %v889_v55, %v885_v42  ;;  %v269_v38 = vsel %vm267_vm14, 1, %v1775_v25  ;;  %v273_v32 = vsel %vm271_vm15, 1, %v1775_v25 }
 0x152   : > { %1079 = vrot.lane.b32.xlu0 %v1076_v49, %s1773_s24  ;;  %v316_v39 = vsel %vm314_vm1, 1, %v1775_v25  ;;  %v275_v1 = vadd.s32 %v273_v32, %v269_v38  ;;  %v279_v53 = vsel %vm277_vm2, 1, %v1775_v25  ;;  %v322_v31 = vsel %vm320_vm3, 1, %v1775_v25 }
 0x153   : > { %v318_v50 = vadd.s32 8, %v316_v39  ;;  %vm283_vm4 = vcmp.ge.s32.totalorder %v3176_v45, 64  ;;  %vm326_vm5 = vcmp.ge.s32.totalorder %v3177_v58, 176  ;;  %vm289_vm6 = vcmp.ge.s32.totalorder %v3176_v45, 80 }
 0x154   : > { %v281_v59 = vadd.s32 %v279_v53, %v275_v1  ;;  %v285_v20 = vsel %vm283_vm4, 1, %v1775_v25  ;;  %v328_v28 = vsel %vm326_vm5, 1, %v1775_v25  ;;  %vm332_vm7 = vcmp.ge.s32.totalorder %v3177_v58, 192 }
 0x155   : > { %v324_v47 = vadd.s32 %v322_v31, %v318_v50  ;;  %v291_v57 = vsel %vm289_vm6, 1, %v1775_v25  ;;  %v334_v62 = vsel %vm332_vm7, 1, %v1775_v25  ;;  %vm295_vm8 = vcmp.ge.s32.totalorder %v3176_v45, 96 }
 0x156   : > { %v287_v5 = vadd.s32 %v285_v20, %v281_v59  ;;  %vm338_vm9 = vcmp.ge.s32.totalorder %v3177_v58, 208  ;;  %v297_v40 = vsel %vm295_vm8, 1, %v1775_v25  ;;  %vm301_vm10 = vcmp.ge.s32.totalorder %v3176_v45, 112 }
 0x157   : > { %v330_v33 = vadd.s32 %v328_v28, %v324_v47  ;;  %v340_v60 = vsel %vm338_vm9, 1, %v1775_v25  ;;  %vm344_vm11 = vcmp.ge.s32.totalorder %v3177_v58, 224  ;;  %v303_v35 = vsel %vm301_vm10, 1, %v1775_v25 }
 0x158   : > { %v293_v37 = vadd.s32 %v291_v57, %v287_v5  ;;  %v346_v63 = vsel %vm344_vm11, 1, %v1775_v25  ;;  %vm350_vm12 = vcmp.ge.s32.totalorder %v3177_v58, 240  ;;  %v3178_v21 = vmov 0 }
 0x159   : > { %v336_v34 = vadd.s32 %v334_v62, %v330_v33  ;;  %v352_v29 = vsel %vm350_vm12, 1, %v1775_v25  ;;  %vm595_vm5 = vcmp.lt.s32.totalorder %v3176_v45, 3  ;;  %vm694_vm11 = vcmp.lt.s32.totalorder %v3176_v45, 2 }
 0x15a   : > { %v299_v4 = vadd.s32 %v297_v40, %v293_v37  ;;  %vm795_vm12 = vcmp.lt.s32.totalorder %v3176_v45, 1 }
 0x15b   : > { %v342_v14 = vadd.s32 %v340_v60, %v336_v34 }
 0x15c   : > { %v305_v43 = vadd.s32 %v303_v35, %v299_v4 }
 0x15d   : > { %v348_v11 = vadd.s32 %v346_v63, %v342_v14 }
 0x15e   : > { %v355_v54 = vmul.u32 16, %v305_v43 }
 0x15f   : > { %v354_v36 = vadd.s32 %v352_v29, %v348_v11 }
 0x160   : > { %v357_v2 = vsub.s32 %v3176_v45, %v355_v54 }
 0x161   : > { %v356_v24 = vmul.u32 16, %v354_v36 }
 0x162   : > { %v697_v9 = vadd.s32 4294967294, %v357_v2  ;;  %v598_v3 = vadd.s32 4294967293, %v357_v2  ;;  %v798_v13 = vadd.s32 4294967295, %v357_v2  ;;  %v983_v49 = vadd.s32 1, %v357_v2 }
 0x163   : > { %v358_v61 = vsub.s32 %v3177_v58, %v356_v24  ;;  %v1084_v59 = vadd.s32 2, %v357_v2  ;;  %v1185_v5 = vadd.s32 3, %v357_v2 }
 0x164   : > { %vm699_vm13 = vcmp.ge.s32.totalorder %v697_v9, 0  ;;  %vm701_vm14 = vcmp.lt.s32.totalorder %v697_v9, 16  ;;  %vm600_vm15 = vcmp.ge.s32.totalorder %v598_v3, 0  ;;  %vm602_vm1 = vcmp.lt.s32.totalorder %v598_v3, 16 }
 0x165   : > { %v599_v19 = vadd.s32 4294967293, %v358_v61  ;;  %v698_v27 = vadd.s32 4294967294, %v358_v61  ;;  %v799_v44 = vadd.s32 4294967295, %v358_v61  ;;  %vm800_vm2 = vcmp.ge.s32.totalorder %v798_v13, 0  ;;  %vm2903_vm4 = vmand %vm699_vm13, %vm701_vm14 }
 0x166   : > { %vm802_vm3 = vcmp.lt.s32.totalorder %v798_v13, 16  ;;  %v3179_v21 = vsel %vm2903_vm4, 4294967295, %v3178_v21  ;;  %vm2908_vm10 = vmand %vm600_vm15, %vm602_vm1  ;;  %v984_v58 = vadd.s32 1, %v358_v61  ;;  %v1085_v47 = vadd.s32 2, %v358_v61 }
 0x167   : > { %vm601_vm6 = vcmp.ge.s32.totalorder %v599_v19, 0  ;;  %vm603_vm7 = vcmp.lt.s32.totalorder %v599_v19, 16  ;;  %vm700_vm8 = vcmp.ge.s32.totalorder %v698_v27, 0  ;;  %vm702_vm9 = vcmp.lt.s32.totalorder %v698_v27, 16  ;;  %vm2914_vm14 = vmand %vm800_vm2, %vm802_vm3 }
 0x168   : > { %vm801_vm0 = vcmp.ge.s32.totalorder %v799_v44, 0  ;;  %vm803_vm13 = vcmp.lt.s32.totalorder %v799_v44, 16  ;;  %vm2918_vm4 = vmand %vm601_vm6, %vm603_vm7  ;;  %vm3190_vm2 = vnez %v3179_v21  ;;  %vm987_vm3 = vcmp.lt.s32.totalorder %v983_v49, 16 }
 0x169   : > { %vm2922_vm15 = vmand %vm700_vm8, %vm702_vm9  ;;  %vm988_vm6 = vcmp.lt.s32.totalorder %v984_v58, 16  ;;  %v1186_v33 = vadd.s32 3, %v358_v61  ;;  %vm1086_vm8 = vcmp.ge.s32.totalorder %v1084_v59, 0  ;;  %vm1087_vm9 = vcmp.ge.s32.totalorder %v1085_v47, 0 }
 0x16a   : > { %vm2926_vm1 = vmand %vm801_vm0, %vm803_vm13  ;;  %vm985_vm0 = vcmp.ge.s32.totalorder %v983_v49, 0  ;;  %vm1187_vm13 = vcmp.ge.s32.totalorder %v1185_v5, 0 }
 0x16b   : > { %vm2943_vm7 = vmand %vm985_vm0, %vm987_vm3  ;;  %vm1081_vm0 = vcmp.lt.s32.totalorder %v3176_v45, 126 }
 0x185   : > { %v794_v17 = vpop.permute.xlu2 %793 }
 0x196   : > { %v691_v16 = vpop.permute.xlu2 %690 }
 0x19e   : > { %v1078_v1 = vpop.permute.xlu2 %1077 }
 0x1a0   : > { %v693_v48 = vpop.permute.xlu0 %692 }
 0x1a1   : > { %v695_v18 = vsel %vm694_vm11, %v691_v16, %v693_v48  ;;  %v696_v10 = vsel %vm694_vm11, %v693_v48, %v691_v16  ;;  %vm1089_vm11 = vcmp.lt.s32.totalorder %v1085_v47, 16 }
 0x1a2   : > { %v705_v25 = vsel %vm3190_vm2, %v696_v10, 0.0  ;;  %v706_v38 = vsel %vm2922_vm15, %v695_v18, 0.0  ;;  %vm1182_vm15 = vcmp.lt.s32.totalorder %v3176_v45, 125  ;;  %vm1190_vm2 = vcmp.lt.s32.totalorder %v1186_v33, 16 }
 0x1a3   : > { %v594_v56 = vpop.permute.xlu1 %593 }
 0x1aa   : > { %v1181_v35 = vpop.permute.xlu2 %1180 }
 0x1ab   : > { %v2901_v52 = vpop.permute.xlu1 %978 }
 0x1b0   : > { %v592_v15 = vpop.permute.xlu0 %591 }
 0x1b1   : > { %v596_v0 = vsel %vm595_vm5, %v592_v15, %v594_v56  ;;  %v597_v6 = vsel %vm595_vm5, %v594_v56, %v592_v15  ;;  %vm986_vm5 = vcmp.ge.s32.totalorder %v984_v58, 0 }
 0x1b2   : > { %v606_v8 = vsel %vm2908_vm10, %v597_v6, 0.0  ;;  %v607_v42 = vsel %vm2918_vm4, %v596_v0, 0.0  ;;  %vm980_vm4 = vcmp.lt.s32.totalorder %v3176_v45, 127  ;;  %vm1088_vm10 = vcmp.lt.s32.totalorder %v1084_v59, 16 }
 0x1b3   : > { %v707_v50 = vadd.f32 %v705_v25, %v606_v8  ;;  %v708_v53 = vadd.f32 %v706_v38, %v607_v42  ;;  %vm2958_vm3 = vmand %vm1086_vm8, %vm1088_vm10 }
 0x1b4   : > { %v792_v41 = vpop.permute.xlu1 %791 }
 0x1b5   : > { %v796_v22 = vsel %vm795_vm12, %v792_v41, %v794_v17  ;;  %v797_v23 = vsel %vm795_vm12, %v794_v17, %v792_v41  ;;  %vm2949_vm12 = vmand %vm986_vm5, %vm988_vm6 }
 0x1b6   : > { %v806_v32 = vsel %vm2914_vm14, %v797_v23, 0.0  ;;  %v807_v39 = vsel %vm2926_vm1, %v796_v22, 0.0  ;;  %vm1189_vm14 = vcmp.lt.s32.totalorder %v1185_v5, 16  ;;  %vm1188_vm1 = vcmp.ge.s32.totalorder %v1186_v33, 0 }
 0x1b7   : > { %v808_v20 = vadd.f32 %v806_v32, %v707_v50  ;;  %v809_v28 = vadd.f32 %v807_v39, %v708_v53  ;;  %vm1191_vm5 = vmand %vm1187_vm13, %vm1189_vm14 }
 0x1b8   : > { %vm1192_vm6 = vmand %vm1188_vm1, %vm1190_vm2  ;;  %vm3204_vm2 = vcmask 1043456  }
 0x1b9   : > { %v892_v62 = vadd.f32 %v2880_v7, %v808_v20  ;;  %v893_v37 = vadd.f32 %v2882_v30, %v809_v28 }
 0x1bb   : > { %v977_v31 = vpop.permute.xlu0 %976 }
 0x1bc   : > { %v981_v40 = vsel %vm980_vm4, %v977_v31, %v2901_v52  ;;  %v982_v60 = vsel %vm980_vm4, %v2901_v52, %v977_v31  ;;  %vm1091_vm4 = vmand %vm1087_vm9, %vm1089_vm11 }
 0x1bd   : > { %v991_v30 = vsel %vm2943_vm7, %v981_v40, 0.0  ;;  %v992_v14 = vsel %vm2949_vm12, %v982_v60, 0.0 }
 0x1be   : > { %v1179_v4 = vpop.permute.xlu1 %1178  ;;  %v993_v63 = vadd.f32 %v991_v30, %v892_v62  ;;  %v994_v43 = vadd.f32 %v992_v14, %v893_v37 }
 0x1bf   : > { %v1183_v29 = vsel %vm1182_vm15, %v1179_v4, %v1181_v35  ;;  %v1184_v36 = vsel %vm1182_vm15, %v1181_v35, %v1179_v4  ;;  %vm1247_vm15 = vcmask 1040384  }
 0x1c0   : > { %v1193_v61 = vsel %vm1191_vm5, %v1183_v29, 0.0  ;;  %v1194_v9 = vsel %vm1192_vm6, %v1184_v36, 0.0 }
 0x1c4   : > { %v1080_v11 = vpop.permute.xlu0 %1079 }
 0x1c5   : > { %v1082_v54 = vsel %vm1081_vm0, %v1078_v1, %v1080_v11  ;;  %v1083_v56 = vsel %vm1081_vm0, %v1080_v11, %v1078_v1  ;;  %v3201_v1 = vlaneseq }
 0x1c6   : > { %v1092_v17 = vsel %vm2958_vm3, %v1082_v54, 0.0  ;;  %v1093_v24 = vsel %vm1091_vm4, %v1083_v56, 0.0 }
 0x1c7   : > { %v1094_v2 = vadd.f32 %v1092_v17, %v993_v63  ;;  %v1095_v48 = vadd.f32 %v1093_v24, %v994_v43  ;;  %vm1252_vm1 = vcmp.lt.s32.totalorder %v3201_v1, 256 }
 0x1c9   : > { %v1195_v3 = vadd.f32 %v1193_v61, %v1094_v2  ;;  %v1196_v52 = vadd.f32 %v1194_v9, %v1095_v48 }
 0x1cb   : > { %v1515_v13 = vmul.f32 -1.442695, %v1195_v3  ;;  %v1516_v19 = vmul.f32 -1.442695, %v1196_v52 }
 0x1cd   : > { %1604 = vpow2.f32 %v1515_v13 }
 0x1ce   : > { %1606 = vpow2.f32 %v1516_v19 }
 0x1d3   : > { %v1605_v27 = vpop.eup %1604 }
 0x1d4   : > { %v1607_v45 = vpop.eup %1606  ;;  %v1203_v44 = vadd.f32 1.0, %v1605_v27 }
 0x1d5   : > { %v1204_v16 = vadd.f32 1.0, %v1607_v45 }
 0x1d6   : > { %1608 = vrcp.f32 %v1203_v44  ;;  %v1216_v41 = vand.u32 2147483648, %v1203_v44  ;;  %v1214_v18 = vand.u32 2147483647, %v1203_v44  ;;  %vm1210_vm9 = vweird.f32 %v1203_v44 }
 0x1d7   : > { %1610 = vrcp.f32 %v1204_v16  ;;  %v1231_v51 = vand.u32 2147483648, %v1204_v16  ;;  %v1229_v55 = vand.u32 2147483647, %v1204_v16  ;;  %vm1225_vm11 = vweird.f32 %v1204_v16 }
 0x1d8   : > { %v1217_v42 = vor.u32 1.1754944e-38, %v1216_v41  ;;  %vm1215_vm13 = vcmp.eq.f32.partialorder %v1214_v18, 8.507059e+37 }
 0x1d9   : > { %v1232_v49 = vor.u32 1.1754944e-38, %v1231_v51  ;;  %vm1230_vm14 = vcmp.eq.f32.partialorder %v1229_v55, 8.507059e+37 }
 0x1dc   : > { %v1609_v21 = vpop.eup %1608 }
 0x1dd   : > { %v1611_v15 = vpop.eup %1610  ;;  %v1206_v26 = vmul.f32 %v1609_v21, %v1203_v44  ;;  %vm1211_vm7 = vweird.f32 %v1609_v21 }
 0x1de   : > { %v1221_v46 = vmul.f32 %v1611_v15, %v1204_v16  ;;  %vm1226_vm8 = vweird.f32 %v1611_v15  ;;  %vm1212_vm10 = vmor %vm1210_vm9, %vm1211_vm7 }
 0x1df   : > { %v1207_v12 = vsub.f32 1.0, %v1206_v26  ;;  %vm1227_vm12 = vmor %vm1225_vm11, %vm1226_vm8 }
 0x1e0   : > { %v1222_v0 = vsub.f32 1.0, %v1221_v46 }
 0x1e1   : > { %v1208_v6 = vmul.f32 %v1609_v21, %v1207_v12 }
 0x1e2   : > { %v1223_v10 = vmul.f32 %v1611_v15, %v1222_v0 }
 0x1e3   : > { %v1209_v22 = vadd.f32 %v1609_v21, %v1208_v6 }
 0x1e4   : > { %v1224_v23 = vadd.f32 %v1611_v15, %v1223_v10 }
 0x1e5   : > { %v1213_v8 = vsel %vm1212_vm10, %v1609_v21, %v1209_v22 }
 0x1e6   : > { %v1228_v58 = vsel %vm1227_vm12, %v1611_v15, %v1224_v23  ;;  %v1218_v25 = vsel %vm1215_vm13, %v1217_v42, %v1213_v8 }
 0x1e7   : > { %v1233_v38 = vsel %vm1230_vm14, %v1232_v49, %v1228_v58  ;;  %v1235_v50 = vperm.slane %v1218_v25, 0 }
 0x1e8   : > { %v1236_v32 = vperm.slane %v1233_v38, 0  ;;  %v1246_v39 = vrot.slane %v1233_v38, 7 }
 0x1ea   : > { %v1239_v53 = vrot.slane %v1236_v32, 4  ;;  %v1248_v31 = vsel %vm1247_vm15, %v1218_v25, %v1246_v39 }
 0x1eb   : > { %1254 = vst.msk [vmem:[%s213_s6] sm:$0x3] %vm1252_vm1, %v1248_v31 }
 0x1ec   : > { %v1240_v59 = vsel %vm3204_vm2, %v1235_v50, %v1239_v53 }
 0x1ed   : > { %1684 = shalt.err (!%p1681_p11)
}
 0x1ee   : > { %1533 = dma.vmem_to_hbm [thread:$0]  (%p1862_p3), %s1289_s28, 32, %s1291_s5, %s1261_s21   ;;  %v3205_v47 = vld [vmem:[#allocation24_spill] sm:$0xff] }
 0x1ef   : > { %v1242_v20 = vmul.f32 %v1240_v59, %v3205_v47  ;;  %s1256_s2 = scalar_lea.sflag [#allocation4], %s3198_s1  ;;  %s1699_s12 = sshra.s32 %s1277_s20, 4  ;;  %s1700_s12 = int_to_ptr.hbm [resolvable:$true] %s1699_s12 }
 0x1f0   : > { %s1701_s0 = scalar_lea.hbm %s1700_s12, 8  ;;  %s1705_s16 = scalar_lea.hbm %s3200_s18, 16 }
 0x1f1   : > { %1243 = vst [vmem:[%s206_s11] sm:$0xff] %v1242_v20  ;;  %p1702_p12 = scmp.ne.s32.totalorder %s1700_s12, %s1701_s0  ;;  %p1706_p5 = scmp.lt.s32.totalorder %s1700_s12, %s3200_s18 }
 0x1f2   : > { %p1707_p7 = scmp.lt.s32.totalorder %s1705_s16, %s1701_s0 }
 0x1f3   : > { %p1703_p13 = pnand %p1702_p12, %p1862_p3 }
 0x1f4   : > { %p1708_p1 = por %p1707_p7, %p1706_p5 }
 0x1f5   : > { %p1704_p0 = pneg %p1703_p13 }
 0x1f7   : > { %p1709_p4 = pnand %p1708_p1, %p1704_p0 }
 0x1f9   : > { %1712 = shalt.err (!%p1709_p4)
}
 0x1fa   : > { %1532 = dma.vmem_to_hbm [thread:$0]  (%p1862_p3), %s1275_s17, 128, %s1277_s20, %s1256_s2  }
 0x1fb PF: > { %s3206_s1 = sld [smem:[#allocation14_spill]] }
 0x1fc   : > { %s3208_s6 = sld [smem:[#allocation17_spill]] }
 0x201   : > { %s1302_s28 = sand.u32 1, %s3206_s1  }
 0x202   : > { %p3209_p8 = scmp.ge.s32.totalorder %s3208_s6, 2  ;;  %s1303_s5 = scalar_lea.sflag [#allocation4], %s1302_s28 }
 0x204   : > { %p1545_p9 = pnand %p3209_p8, %p1831_p6 }
 0x206   : > { %p1546_p10 = pneg %p1545_p9 }
 0x208   : > { %1738 = dma.done.wait (%p1546_p10), %s1303_s5, 128  }
 0x209   : > { %1740 = vsyncadd (%p1546_p10), %s1303_s5, 4294967168  ;;  %s1313_s7 = scalar_lea.sflag [#allocation9], %s1302_s28 }
 0x20a   : > { %1742 = dma.done.wait (%p1546_p10), %s1313_s7, 32  }
 0x20b   : > { %1744 = vsyncadd (%p1546_p10), %s1313_s7, 4294967264  ;;  %s3210_s15 = sld [smem:[#allocation20_spill]] }
 0x20c   : > { %s3211_s12 = sld [smem:[#allocation15_spill]] }
 0x20d   : > { %s3212_s13 = sld [smem:[#allocation16_spill]] }
 0x20e   : > { %s3213_s14 = sld [smem:[#allocation21_spill]] }
 0x211   : > { %p21_p3 = scmp.ge.s32.totalorder %s3210_s15, 4  }
 0x213   :  { %23 = sbr.rel (!%p21_p3) target bundleno = 13 (0xd), region = 95 }
 0x218   :  { %1319 = vsyncpa [#allocation3], 1 }
 0x219   :  { %1321 = vsyncpa [#allocation3 + $0x1], 1 }
 0x21a   :  { %1322 = vsyncpa [#allocation4], 1 }
 0x21b   :  { %1324 = vsyncpa [#allocation4 + $0x1], 1 }
 0x21c   :  { %1325 = vsyncpa [#allocation9], 1 }
 0x21d   :  { %1327 = vsyncpa [#allocation9 + $0x1], 1 }
 0x21e   :  { %1328 = vsyncpa [#allocation5], 1 }
 0x21f   :  { %1330 = vsyncpa [#allocation5 + $0x1], 1 }

</bundles_post_ra>
